<compile_context>
chip_gen: v7x
topology: tpu7x:2x2x1
jax: 0.10.0
libtpu: 0.0.40
codegen_flags: <defaults>
</compile_context>

<pallas_src>
import math

import jax
import jax.numpy as jnp
from jax import lax
from jax.experimental import pallas as pl
from jax.experimental.pallas import tpu as pltpu

H1 = 512   # first hidden width (fixed by the module)
H2 = 256   # second hidden width (fixed by the module)


def _round_up(a, m):
    return ((a + m - 1) // m) * m


def discriminator_kernel(x_ref, w1t_ref, b1_ref, w2t_ref, b2_ref,
                         w3_ref, b3_ref, out_ref, acc_ref):
    # Grid: (batch tiles, K tiles).  x_ref block: (Bt, tk) bf16.
    k = pl.program_id(1)
    nk = pl.num_programs(1)

    @pl.when(k == 0)
    def _init():
        acc_ref[...] = jnp.zeros_like(acc_ref)

    # ---- Linear(D -> 512), K-tiled: bf16 MXU matmul, f32 accumulation ----
    acc_ref[...] += jnp.dot(x_ref[...], w1t_ref[...],
                            preferred_element_type=jnp.float32)

    @pl.when(k == nk - 1)
    def _finalize():
        # Epilogue of layer 1 in f32.
        h = acc_ref[...] + b1_ref[...]
        h = jnp.maximum(h, 0.2 * h)                      # LeakyReLU(0.2), 1 VALU op

        # ---- Linear(512 -> 256) + LeakyReLU(0.2): bf16 MXU, f32 accumulate ----
        h = jnp.dot(h.astype(jnp.bfloat16), w2t_ref[...],
                    preferred_element_type=jnp.float32) + b2_ref[...]
        h = jnp.maximum(h, 0.2 * h)

        # ---- Linear(256 -> 1): N=1 wastes the MXU, so do it on the VPU as a
        # broadcast-multiply + lane reduce (f32). b3 is an SMEM scalar. ----
        z = jnp.sum(h * w3_ref[...], axis=-1, keepdims=True) + b3_ref[0]   # (Bt, 1)

        # Transpose to a lane-dense (1, Bt) row (XLU is idle here), then a
        # numerically-stable sigmoid via tanh (EUP slot).
        zr = jnp.transpose(z)                                              # (1, Bt)
        out_ref[...] = 0.5 * (jnp.tanh(0.5 * zr) + 1.0)


def discriminator(img, w1, b1, w2, b2, w3, b3, *, block_b=256, block_k=1024):
    """img: (B, *img_shape) float32.
    w1: (512, D), b1: (512,), w2: (256, 512), b2: (256,), w3: (1, 256), b3: (1,).
    Returns (B, 1) validity scores, matching the PyTorch forward."""
    B = img.shape[0]
    D = math.prod(img.shape[1:])
    x = img.reshape(B, D).astype(jnp.float32)
    w1 = jnp.asarray(w1, jnp.float32)

    # ---- Feature (K) axis: pad to a lane multiple and pick a K tile so the
    # resident x / W1^T tiles stay bounded even for large images. ----
    Dp = _round_up(D, 128)
    tk = min(_round_up(block_k, 128), Dp)
    Dp = _round_up(Dp, tk)
    if Dp != D:
        x = jnp.pad(x, ((0, 0), (0, Dp - D)))
        w1 = jnp.pad(w1, ((0, 0), (0, Dp - D)))          # zero cols: exact

    # ---- Batch tile: multiple of 128 (lane-dense output rows); keep >= 2 grid
    # steps when the batch allows it (shards across v7x's 2 TensorCores). ----
    block_b = max(128, _round_up(block_b, 128))
    Bp128 = _round_up(B, 128)
    if Bp128 <= 128:
        Bt = 128
    else:
        Bt = min(block_b, _round_up(-(-Bp128 // 2), 128))
    Bp = _round_up(B, Bt)
    if Bp != B:
        x = jnp.pad(x, ((0, Bp - B), (0, 0)))            # garbage rows dropped below

    # bf16 matmul operands (f32 accumulation in-kernel); f32 epilogue params.
    xb = x.astype(jnp.bfloat16)
    w1t = w1.T.astype(jnp.bfloat16)                              # (Dp, 512)
    w2t = jnp.asarray(w2, jnp.float32).T.astype(jnp.bfloat16)    # (512, 256)
    b1_2d = jnp.asarray(b1, jnp.float32).reshape(1, H1)
    b2_2d = jnp.asarray(b2, jnp.float32).reshape(1, H2)
    w3_2d = jnp.asarray(w3, jnp.float32).reshape(1, H2)
    b3_1d = jnp.asarray(b3, jnp.float32).reshape(1)              # SMEM scalar

    nb, nk = Bp // Bt, Dp // tk

    # VMEM budget: double-buffered bf16 tiles + f32 accumulator, with headroom.
    vmem_need = (2 * (Bt * tk + tk * H1 + H1 * H2) * 2
                 + Bt * H1 * 4
                 + 4 * (H1 + 2 * H2 + 2 * Bt))
    vmem_limit = int(min(max(2 * vmem_need, 32 * 1024 * 1024), 96 * 1024 * 1024))

    out = pl.pallas_call(
        discriminator_kernel,
        out_shape=jax.ShapeDtypeStruct((1, Bp), jnp.float32),
        grid_spec=pltpu.PrefetchScalarGridSpec(
            num_scalar_prefetch=0,
            grid=(nb, nk),
            in_specs=[
                pl.BlockSpec((Bt, tk), lambda i, k: (i, k)),     # x tile
                pl.BlockSpec((tk, H1), lambda i, k: (k, 0)),     # W1^T K-tile
                pl.BlockSpec((1, H1), lambda i, k: (0, 0)),      # b1 (resident)
                pl.BlockSpec((H1, H2), lambda i, k: (0, 0)),     # W2^T (resident)
                pl.BlockSpec((1, H2), lambda i, k: (0, 0)),      # b2 (resident)
                pl.BlockSpec((1, H2), lambda i, k: (0, 0)),      # w3 row (resident)
                pl.BlockSpec(memory_space=pltpu.MemorySpace.SMEM),  # b3 scalar
            ],
            out_specs=pl.BlockSpec((1, Bt), lambda i, k: (0, i)),   # lane-dense row
            scratch_shapes=[pltpu.VMEM((Bt, H1), jnp.float32)],     # layer-1 acc
        ),
        compiler_params=pltpu.CompilerParams(
            dimension_semantics=("parallel", "arbitrary"),
            vmem_limit_bytes=vmem_limit),
    )(xb, w1t, b1_2d, w2t, b2_2d, w3_2d, b3_1d)

    return out.reshape(Bp, 1)[:B]


def discriminator_ref(img, w1, b1, w2, b2, w3, b3):
    """Pure-JAX reference mirroring the PyTorch forward, with the same bf16
    rounding of matmul operands the kernel applies (f32 accumulation)."""
    f32 = jnp.float32
    x = img.reshape(img.shape[0], -1).astype(jnp.bfloat16).astype(f32)
    w1b = jnp.asarray(w1, f32).astype(jnp.bfloat16).astype(f32)
    w2b = jnp.asarray(w2, f32).astype(jnp.bfloat16).astype(f32)
    h = jnp.dot(x, w1b.T, precision=lax.Precision.HIGHEST) + b1
    h = jnp.maximum(h, 0.2 * h)
    h = h.astype(jnp.bfloat16).astype(f32)
    h = jnp.dot(h, w2b.T, precision=lax.Precision.HIGHEST) + b2
    h = jnp.maximum(h, 0.2 * h)
    z = jnp.dot(h, jnp.asarray(w3, f32).T, precision=lax.Precision.HIGHEST) + b3
    return jax.nn.sigmoid(z)


if __name__ == "__main__":
    # Small config: img_shape = (1, 16, 16) -> D = 256; batch 16.
    B, C, Hh, Ww = 16, 1, 16, 16
    D = C * Hh * Ww

    key = jax.random.PRNGKey(0)
    kx, k1, k2, k3, k4, k5, k6 = jax.random.split(key, 7)

    img = jax.random.normal(kx, (B, C, Hh, Ww), dtype=jnp.float32)
    w1 = jax.random.normal(k1, (H1, D), dtype=jnp.float32) * 0.05   # Linear(D -> 512)
    b1 = jax.random.normal(k2, (H1,), dtype=jnp.float32) * 0.05
    w2 = jax.random.normal(k3, (H2, H1), dtype=jnp.float32) * 0.05  # Linear(512 -> 256)
    b2 = jax.random.normal(k4, (H2,), dtype=jnp.float32) * 0.05
    w3 = jax.random.normal(k5, (1, H2), dtype=jnp.float32) * 0.05   # Linear(256 -> 1)
    b3 = jax.random.normal(k6, (1,), dtype=jnp.float32) * 0.05

    out = discriminator(img, w1, b1, w2, b2, w3, b3)
    jax.block_until_ready(out)

    ref = discriminator_ref(img, w1, b1, w2, b2, w3, b3)
    assert out.shape == (B, 1), out.shape
    max_err = float(jnp.max(jnp.abs(out - ref)))
    assert jnp.allclose(out, ref, atol=1e-3, rtol=1e-3), f"mismatch vs ref: {max_err}"

    print("KERNEL_OK")
</pallas_src>

<mosaic_0001>
module attributes {stable_mosaic.version = 11 : i64} {
  func.func @discriminator_kernel(%arg0: i32, %arg1: i32, %arg2: memref<128x256xbf16, #tpu.memory_space<vmem>>, %arg3: memref<256x512xbf16, #tpu.memory_space<vmem>>, %arg4: memref<1x512xf32, #tpu.memory_space<vmem>>, %arg5: memref<512x256xbf16, #tpu.memory_space<vmem>>, %arg6: memref<1x256xf32, #tpu.memory_space<vmem>>, %arg7: memref<1x256xf32, #tpu.memory_space<vmem>>, %arg8: memref<1xf32, #tpu.memory_space<smem>>, %arg9: memref<1x128xf32, #tpu.memory_space<vmem>>, %arg10: memref<128x512xf32, #tpu.memory_space<vmem>>) attributes {dimension_semantics = [#tpu.dimension_semantics<parallel>, #tpu.dimension_semantics<arbitrary>], iteration_bounds = array<i64: 1, 1>, scalar_prefetch = 0 : i64, scratch_operands = 1 : i64, tpu.core_type = #tpu.core_type<tc>, window_params = [{transform_indices = @transform_0, window_bounds = array<i64: 128, 256>}, {transform_indices = @transform_1, window_bounds = array<i64: 256, 512>}, {pipeline_mode = #tpu.pipeline_mode<synchronous>, transform_indices = @transform_2, window_bounds = array<i64: 1, 512>}, {pipeline_mode = #tpu.pipeline_mode<synchronous>, transform_indices = @transform_3, window_bounds = array<i64: 512, 256>}, {pipeline_mode = #tpu.pipeline_mode<synchronous>, transform_indices = @transform_4, window_bounds = array<i64: 1, 256>}, {pipeline_mode = #tpu.pipeline_mode<synchronous>, transform_indices = @transform_5, window_bounds = array<i64: 1, 256>}, {transform_indices = @transform_6, window_bounds = array<i64: 1>}, {transform_indices = @transform_7, window_bounds = array<i64: 1, 128>}]} {
    %c0_i32 = arith.constant 0 : i32
    %0 = arith.cmpi eq, %arg1, %c0_i32 : i32
    %1 = arith.extui %0 : i1 to i32
    %c0_i32_0 = arith.constant 0 : i32
    %2 = arith.cmpi ne, %1, %c0_i32_0 : i32
    scf.if %2 {
      %cst_10 = arith.constant 0.000000e+00 : f32
      %12 = vector.broadcast %cst_10 : f32 to vector<128x512xf32>
      %c0_11 = arith.constant 0 : index
      %c0_12 = arith.constant 0 : index
      %13 = vector.load %arg10[%c0_11, %c0_12] : memref<128x512xf32, #tpu.memory_space<vmem>>, vector<128x512xf32>
      tpu.vector_store %arg10[%c0_11, %c0_12], %12 {strides = array<i32>} : memref<128x512xf32, #tpu.memory_space<vmem>>, vector<128x512xf32>,
    } else {
    }
    %c0 = arith.constant 0 : index
    %c0_1 = arith.constant 0 : index
    %3 = vector.load %arg10[%c0, %c0_1] : memref<128x512xf32, #tpu.memory_space<vmem>>, vector<128x512xf32>
    %c0_2 = arith.constant 0 : index
    %c0_3 = arith.constant 0 : index
    %4 = vector.load %arg2[%c0_2, %c0_3] : memref<128x256xbf16, #tpu.memory_space<vmem>>, vector<128x256xbf16>
    %c0_4 = arith.constant 0 : index
    %c0_5 = arith.constant 0 : index
    %5 = vector.load %arg3[%c0_4, %c0_5] : memref<256x512xbf16, #tpu.memory_space<vmem>>, vector<256x512xbf16>
    %cst = arith.constant dense<0.000000e+00> : vector<128x512xf32>
    %6 = tpu.matmul %4, %5, %cst {dimension_numbers = #tpu.dot_dimension_numbers<[1], [0], [0], [1], [0, 0, 1, 1], [], []>} : vector<128x256xbf16>, vector<256x512xbf16>, vector<128x512xf32> -> vector<128x512xf32>
    %7 = arith.addf %3, %6 : vector<128x512xf32>
    %c0_6 = arith.constant 0 : index
    %c0_7 = arith.constant 0 : index
    %8 = vector.load %arg10[%c0_6, %c0_7] : memref<128x512xf32, #tpu.memory_space<vmem>>, vector<128x512xf32>
    tpu.vector_store %arg10[%c0_6, %c0_7], %7 {strides = array<i32>} : memref<128x512xf32, #tpu.memory_space<vmem>>, vector<128x512xf32>,
    %c0_i32_8 = arith.constant 0 : i32
    %9 = arith.cmpi eq, %arg1, %c0_i32_8 : i32
    %10 = arith.extui %9 : i1 to i32
    %c0_i32_9 = arith.constant 0 : i32
    %11 = arith.cmpi ne, %10, %c0_i32_9 : i32
    scf.if %11 {
      %c0_10 = arith.constant 0 : index
      %c0_11 = arith.constant 0 : index
      %12 = vector.load %arg10[%c0_10, %c0_11] : memref<128x512xf32, #tpu.memory_space<vmem>>, vector<128x512xf32>
      %c0_12 = arith.constant 0 : index
      %c0_13 = arith.constant 0 : index
      %13 = vector.load %arg4[%c0_12, %c0_13] : memref<1x512xf32, #tpu.memory_space<vmem>>, vector<1x512xf32>
      %14 = vector.broadcast %13 : vector<1x512xf32> to vector<128x512xf32>
      %15 = arith.addf %12, %14 : vector<128x512xf32>
      %cst_14 = arith.constant 2.000000e-01 : f32
      %16 = vector.broadcast %cst_14 : f32 to vector<128x512xf32>
      %17 = arith.mulf %16, %15 : vector<128x512xf32>
      %18 = arith.maximumf %15, %17 : vector<128x512xf32>
      %19 = arith.truncf %18 : vector<128x512xf32> to vector<128x512xbf16>
      %c0_15 = arith.constant 0 : index
      %c0_16 = arith.constant 0 : index
      %20 = vector.load %arg5[%c0_15, %c0_16] : memref<512x256xbf16, #tpu.memory_space<vmem>>, vector<512x256xbf16>
      %cst_17 = arith.constant dense<0.000000e+00> : vector<128x256xf32>
      %21 = tpu.matmul %19, %20, %cst_17 {dimension_numbers = #tpu.dot_dimension_numbers<[1], [0], [0], [1], [0, 0, 1, 1], [], []>} : vector<128x512xbf16>, vector<512x256xbf16>, vector<128x256xf32> -> vector<128x256xf32>
      %c0_18 = arith.constant 0 : index
      %c0_19 = arith.constant 0 : index
      %22 = vector.load %arg6[%c0_18, %c0_19] : memref<1x256xf32, #tpu.memory_space<vmem>>, vector<1x256xf32>
      %23 = vector.broadcast %22 : vector<1x256xf32> to vector<128x256xf32>
      %24 = arith.addf %21, %23 : vector<128x256xf32>
      %cst_20 = arith.constant 2.000000e-01 : f32
      %25 = vector.broadcast %cst_20 : f32 to vector<128x256xf32>
      %26 = arith.mulf %25, %24 : vector<128x256xf32>
      %27 = arith.maximumf %24, %26 : vector<128x256xf32>
      %c0_21 = arith.constant 0 : index
      %c0_22 = arith.constant 0 : index
      %28 = vector.load %arg7[%c0_21, %c0_22] : memref<1x256xf32, #tpu.memory_space<vmem>>, vector<1x256xf32>
      %29 = vector.broadcast %28 : vector<1x256xf32> to vector<128x256xf32>
      %30 = arith.mulf %27, %29 : vector<128x256xf32>
      %cst_23 = arith.constant dense<0.000000e+00> : vector<128xf32>
      %31 = vector.multi_reduction <add>, %30, %cst_23 [1] : vector<128x256xf32> to vector<128xf32>
      %32 = vector.shape_cast %31 : vector<128xf32> to vector<128x1xf32>
      %c0_24 = arith.constant 0 : index
      %33 = memref.load %arg8[%c0_24] : memref<1xf32, #tpu.memory_space<smem>>
      %34 = vector.broadcast %33 : f32 to vector<128x1xf32>
      %35 = arith.addf %32, %34 : vector<128x1xf32>
      %36 = tpu.transpose %35, [1, 0] : vector<128x1xf32> -> vector<1x128xf32>
      %cst_25 = arith.constant 5.000000e-01 : f32
      %37 = vector.broadcast %cst_25 : f32 to vector<1x128xf32>
      %38 = arith.mulf %37, %36 : vector<1x128xf32>
      %39 = math.tanh %38 : vector<1x128xf32>
      %cst_26 = arith.constant 1.000000e+00 : f32
      %40 = vector.broadcast %cst_26 : f32 to vector<1x128xf32>
      %41 = arith.addf %39, %40 : vector<1x128xf32>
      %cst_27 = arith.constant 5.000000e-01 : f32
      %42 = vector.broadcast %cst_27 : f32 to vector<1x128xf32>
      %43 = arith.mulf %42, %41 : vector<1x128xf32>
      %c0_28 = arith.constant 0 : index
      %c0_29 = arith.constant 0 : index
      %44 = vector.load %arg9[%c0_28, %c0_29] : memref<1x128xf32, #tpu.memory_space<vmem>>, vector<1x128xf32>
      tpu.vector_store %arg9[%c0_28, %c0_29], %43 {strides = array<i32>} : memref<1x128xf32, #tpu.memory_space<vmem>>, vector<1x128xf32>,
    } else {
    }
    return
  }
  func.func @transform_0(%arg0: i32, %arg1: i32) -> (i32, i32) {
    %c0_i32 = arith.constant 0 : i32
    return %arg0, %arg1 : i32, i32
  }
  func.func @transform_1(%arg0: i32, %arg1: i32) -> (i32, i32) {
    %c0_i32 = arith.constant 0 : i32
    %c0_i32_0 = arith.constant 0 : i32
    return %arg1, %c0_i32 : i32, i32
  }
  func.func @transform_2(%arg0: i32, %arg1: i32) -> (i32, i32) {
    %c0_i32 = arith.constant 0 : i32
    %c0_i32_0 = arith.constant 0 : i32
    %c0_i32_1 = arith.constant 0 : i32
    return %c0_i32, %c0_i32_0 : i32, i32
  }
  func.func @transform_3(%arg0: i32, %arg1: i32) -> (i32, i32) {
    %c0_i32 = arith.constant 0 : i32
    %c0_i32_0 = arith.constant 0 : i32
    %c0_i32_1 = arith.constant 0 : i32
    return %c0_i32, %c0_i32_0 : i32, i32
  }
  func.func @transform_4(%arg0: i32, %arg1: i32) -> (i32, i32) {
    %c0_i32 = arith.constant 0 : i32
    %c0_i32_0 = arith.constant 0 : i32
    %c0_i32_1 = arith.constant 0 : i32
    return %c0_i32, %c0_i32_0 : i32, i32
  }
  func.func @transform_5(%arg0: i32, %arg1: i32) -> (i32, i32) {
    %c0_i32 = arith.constant 0 : i32
    %c0_i32_0 = arith.constant 0 : i32
    %c0_i32_1 = arith.constant 0 : i32
    return %c0_i32, %c0_i32_0 : i32, i32
  }
  func.func @transform_6(%arg0: i32, %arg1: i32) -> i32 {
    %c0_i32 = arith.constant 0 : i32
    %c0_i32_0 = arith.constant 0 : i32
    return %c0_i32 : i32
  }
  func.func @transform_7(%arg0: i32, %arg1: i32) -> (i32, i32) {
    %c0_i32 = arith.constant 0 : i32
    %c0_i32_0 = arith.constant 0 : i32
    return %c0_i32, %arg0 : i32, i32
  }
}

</mosaic_0001>

<bundles_post_ra>
// kernel: tpu_custom_call.1
= control target key start
LH: loop header
LB: loop body
LE: loop exit
PB: predicated region body
PF: predicated region fallthrough
CT: control target
= control target key end

     0   :  { %13 = vsyncpa [#allocation5], 0  ;;  %s3047_s0 = inlined_call_operand.hbm [shape: bf16[128,256], index: 0, kind: input, shape index: {}]   ;;  %s3048_s1 = inlined_call_operand.hbm [shape: bf16[256,512], index: 1, kind: input, shape index: {}]   ;;  %s3049_s2 = inlined_call_operand.vmem [shape: f32[1,512], index: 2, kind: input, shape index: {}]   ;;  %s3050_s3 = inlined_call_operand.hbm [shape: bf16[512,256], index: 3, kind: input, shape index: {}]   ;;  %s3051_s4 = inlined_call_operand.vmem [shape: f32[1,256], index: 4, kind: input, shape index: {}]   ;;  %s3052_s5 = inlined_call_operand.vmem [shape: f32[1,256], index: 5, kind: input, shape index: {}]   ;;  %s3053_s6 = inlined_call_operand.<no memory space> [shape: f32[1], index: 6, kind: input, shape index: {}]   ;;  %s3054_s7 = inlined_call_operand.hbm [shape: f32[1,128], index: 7, kind: output, shape index: {}]  }
   0x1   :  { %14 = vsyncpa [#allocation8], 0 }
   0x2   :  { %15 = vsyncpa [#allocation6], 0  ;;  %s2725_s24 = smov [#allocation7]   ;;  %s2631_s28 = scalar_lea.hbm %s3048_s1, 8192 }
   0x3   :  { %s33_s25 = sshll.u32 %s2725_s24, 4  ;;  %p2632_p0 = scmp.ne.s32.totalorder %s3048_s1, %s2631_s28  ;;  %s34_s25 = int_to_ptr.vmem [resolvable:$true] %s33_s25 }
   0x4   :  { %p2635_p1 = scmp.lt.u32.totalorder %s2631_s28, %s3048_s1 }
   0x6   :  { %p2637_p2 = pnand %p2635_p1, %p2632_p0 }
   0x8   :  { %2640 = shalt.err (!%p2637_p2)
}
   0x9   :  { %s2641_s10 = scalar_lea.vmem %s34_s25, 8192  ;;  %p2646_p4 = scmp.lt.s32.totalorder %s34_s25, %s34_s25 }
   0xa   :  { %p2642_p3 = scmp.ne.s32.totalorder %s34_s25, %s2641_s10  ;;  %p2647_p5 = scmp.lt.s32.totalorder %s2641_s10, %s2641_s10 }
   0xc   :  { %p2648_p6 = por %p2647_p5, %p2646_p4 }
   0xe   :  { %p2649_p7 = pnand %p2648_p6, %p2642_p3 }
  0x10   :  { %2652 = shalt.err (!%p2649_p7)
}
  0x11   :  { %s2726_s11 = smov 256   ;;  %s2727_s12 = smov 16  }
  0x12   :  { %39 = dma.hbm_to_vmem [thread:$0]  %s3048_s1, 8192, %s34_s25, [#allocation8], %s2726_s11, %s2726_s11, %s2727_s12  }
  0x13   :  { %s2728_s15 = smov [#allocation4]   ;;  %s2653_s19 = scalar_lea.hbm %s3047_s0, 2048 }
  0x14   :  { %s21_s16 = sshll.u32 %s2728_s15, 4  ;;  %p2654_p8 = scmp.ne.s32.totalorder %s3047_s0, %s2653_s19  ;;  %s22_s16 = int_to_ptr.vmem [resolvable:$true] %s21_s16 }
  0x15   :  { %p2657_p9 = scmp.lt.u32.totalorder %s2653_s19, %s3047_s0 }
  0x17   :  { %p2659_p10 = pnand %p2657_p9, %p2654_p8 }
  0x19   :  { %2662 = shalt.err (!%p2659_p10)
}
  0x1a   :  { %s2663_s24 = scalar_lea.vmem %s22_s16, 2048  ;;  %p2668_p12 = scmp.lt.s32.totalorder %s22_s16, %s22_s16 }
  0x1b   :  { %p2664_p11 = scmp.ne.s32.totalorder %s22_s16, %s2663_s24  ;;  %p2669_p13 = scmp.lt.s32.totalorder %s2663_s24, %s2663_s24 }
  0x1d   :  { %p2670_p0 = por %p2669_p13, %p2668_p12 }
  0x1f   :  { %p2671_p1 = pnand %p2670_p0, %p2664_p11 }
  0x21   :  { %2674 = shalt.err (!%p2671_p1)
}
  0x22   :  { %s2729_s1 = smov 128   ;;  %s2730_s25 = smov 8  }
  0x23   :  { %27 = dma.hbm_to_vmem [thread:$0]  %s3047_s0, 2048, %s22_s16, [#allocation5], %s2729_s1, %s2729_s1, %s2730_s25  }
  0x24   :  { %s2731_s28 = smov [#allocation9]   ;;  %s2675_s9 = scalar_lea.hbm %s3050_s3, 8192 }
  0x25   :  { %s47_s29 = sshll.u32 %s2731_s28, 4  ;;  %p2676_p2 = scmp.ne.s32.totalorder %s3050_s3, %s2675_s9  ;;  %s48_s29 = int_to_ptr.vmem [resolvable:$true] %s47_s29 }
  0x26   :  { %p2679_p3 = scmp.lt.u32.totalorder %s2675_s9, %s3050_s3 }
  0x28   :  { %p2681_p4 = pnand %p2679_p3, %p2676_p2 }
  0x2a   :  { %2684 = shalt.err (!%p2681_p4)
}
  0x2b   :  { %s2685_s14 = scalar_lea.vmem %s48_s29, 8192  ;;  %p2690_p6 = scmp.lt.s32.totalorder %s48_s29, %s48_s29 }
  0x2c   :  { %p2686_p5 = scmp.ne.s32.totalorder %s48_s29, %s2685_s14  ;;  %p2691_p7 = scmp.lt.s32.totalorder %s2685_s14, %s2685_s14 }
  0x2e   :  { %p2692_p8 = por %p2691_p7, %p2690_p6 }
  0x30   :  { %p2693_p9 = pnand %p2692_p8, %p2686_p5 }
  0x32   :  { %2696 = shalt.err (!%p2693_p9)
}
  0x33   :  { %53 = dma.hbm_to_vmem [thread:$0]  %s3050_s3, 8192, %s48_s29, [#allocation8], %s2729_s1, %s2729_s1, %s2730_s25  }
  0x34   :  { %2719 = dma.done.wait [#allocation5], 2048  }
  0x35   :  { %2720 = vsyncadd [#allocation5], 4294965248 }
  0x36   :  { %2721 = dma.done.wait [#allocation8], 16384  }
  0x37   :  { %2722 = vsyncadd [#allocation8], 4294950912  ;;  %v2413_v0 = vld [vmem:[#allocation7 + $0x4] ss:$16 sps:$4 sm:$0xff]   ;;  %v2415_v1 = vld [vmem:[#allocation7] ss:$16 sps:$4 sm:$0xff]  }
  0x38   :  { %681 = vmatprep.subr.bf16.mxu1 %v2413_v0  ;;  %v2416_v2 = vld [vmem:[#allocation7 + $0x24] ss:$16 sps:$4 sm:$0xff]   ;;  %v2418_v3 = vld [vmem:[#allocation7 + $0x20] ss:$16 sps:$4 sm:$0xff]   ;;  %v2466_v36 = vld [vmem:[#allocation7 + $0xc] ss:$16 sps:$4 sm:$0xff]  }
  0x39   :  { %682 = vmatpush1.bf16.msra.mxu1 %v2415_v1  ;;  %v2419_v4 = vld [vmem:[#allocation7 + $0x44] ss:$16 sps:$4 sm:$0xff]   ;;  %v2421_v5 = vld [vmem:[#allocation7 + $0x40] ss:$16 sps:$4 sm:$0xff]   ;;  %v2464_v40 = vld [vmem:[#allocation7 + $0x8] ss:$16 sps:$4 sm:$0xff]  }
  0x3a   :  { %683 = vmatprep.subr.bf16.mxu1 %v2416_v2  ;;  %v2422_v6 = vld [vmem:[#allocation7 + $0x64] ss:$16 sps:$4 sm:$0xff]   ;;  %v2424_v7 = vld [vmem:[#allocation7 + $0x60] ss:$16 sps:$4 sm:$0xff]   ;;  %v2469_v42 = vld [vmem:[#allocation7 + $0x2c] ss:$16 sps:$4 sm:$0xff]  }
  0x3b   :  { %v2425_v8 = vld [vmem:[#allocation7 + $0x84] ss:$16 sps:$4 sm:$0xff]   ;;  %v2427_v9 = vld [vmem:[#allocation7 + $0x80] ss:$16 sps:$4 sm:$0xff]   ;;  %v2467_v45 = vld [vmem:[#allocation7 + $0x28] ss:$16 sps:$4 sm:$0xff]  }
  0x3c   :  { %v2428_v10 = vld [vmem:[#allocation7 + $0xa4] ss:$16 sps:$4 sm:$0xff]   ;;  %v2430_v11 = vld [vmem:[#allocation7 + $0xa0] ss:$16 sps:$4 sm:$0xff]   ;;  %v2475_v47 = vld [vmem:[#allocation7 + $0x4c] ss:$16 sps:$4 sm:$0xff]  }
  0x3d   :  { %684 = vmatpush1.bf16.msra.mxu1 %v2418_v3  ;;  %v2431_v12 = vld [vmem:[#allocation7 + $0xc4] ss:$16 sps:$4 sm:$0xff]   ;;  %v2433_v14 = vld [vmem:[#allocation7 + $0xc0] ss:$16 sps:$4 sm:$0xff]   ;;  %v2473_v48 = vld [vmem:[#allocation7 + $0x48] ss:$16 sps:$4 sm:$0xff]  }
  0x3e   :  { %685 = vmatprep.subr.bf16.mxu1 %v2419_v4  ;;  %v2809_v13 = vld [vmem:[#allocation4 + $0x4] ss:$8 sps:$4 sm:$0xff]   ;;  %v2436_v16 = vld [vmem:[#allocation7 + $0xe0] ss:$16 sps:$4 sm:$0xff]   ;;  %v2536_v34 = vld [vmem:[#allocation9 + $0x14] ss:$8 sps:$4 sm:$0xff]  }
  0x3f   :  { %v2434_v15 = vld [vmem:[#allocation7 + $0xe4] ss:$16 sps:$4 sm:$0xff]   ;;  %713 = vmatprep.mubr.bf16.mxu1 %v2809_v13  ;;  %v2439_v18 = vld [vmem:[#allocation7 + $0x100] ss:$16 sps:$4 sm:$0xff]   ;;  %v2478_v50 = vld [vmem:[#allocation7 + $0x6c] ss:$16 sps:$4 sm:$0xff]  }
  0x40   :  { %v2437_v17 = vld [vmem:[#allocation7 + $0x104] ss:$16 sps:$4 sm:$0xff]   ;;  %v2442_v20 = vld [vmem:[#allocation7 + $0x120] ss:$16 sps:$4 sm:$0xff]   ;;  %v2476_v55 = vld [vmem:[#allocation7 + $0x68] ss:$16 sps:$4 sm:$0xff]  }
  0x41   :  { %686 = vmatpush1.bf16.msra.mxu1 %v2421_v5  ;;  %v2440_v19 = vld [vmem:[#allocation7 + $0x124] ss:$16 sps:$4 sm:$0xff]   ;;  %v2445_v22 = vld [vmem:[#allocation7 + $0x140] ss:$16 sps:$4 sm:$0xff]   ;;  %v2484_v56 = vld [vmem:[#allocation7 + $0x8c] ss:$16 sps:$4 sm:$0xff]  }
  0x42   :  { %687 = vmatprep.subr.bf16.mxu1 %v2422_v6  ;;  %v2443_v21 = vld [vmem:[#allocation7 + $0x144] ss:$16 sps:$4 sm:$0xff]   ;;  %v2448_v24 = vld [vmem:[#allocation7 + $0x160] ss:$16 sps:$4 sm:$0xff]   ;;  %v2482_v60 = vld [vmem:[#allocation7 + $0x88] ss:$16 sps:$4 sm:$0xff]  }
  0x43   :  { %v2446_v23 = vld [vmem:[#allocation7 + $0x164] ss:$16 sps:$4 sm:$0xff]   ;;  %v2451_v26 = vld [vmem:[#allocation7 + $0x180] ss:$16 sps:$4 sm:$0xff]   ;;  %v2487_v62 = vld [vmem:[#allocation7 + $0xac] ss:$16 sps:$4 sm:$0xff]  }
  0x44   :  { %v2449_v25 = vld [vmem:[#allocation7 + $0x184] ss:$16 sps:$4 sm:$0xff]   ;;  %v2454_v28 = vld [vmem:[#allocation7 + $0x1a0] ss:$16 sps:$4 sm:$0xff]   ;;  %v2485_v1 = vld [vmem:[#allocation7 + $0xa8] ss:$16 sps:$4 sm:$0xff]  }
  0x45   :  { %688 = vmatpush1.bf16.msra.mxu1 %v2424_v7  ;;  %v2452_v27 = vld [vmem:[#allocation7 + $0x1a4] ss:$16 sps:$4 sm:$0xff]   ;;  %v2457_v30 = vld [vmem:[#allocation7 + $0x1c0] ss:$16 sps:$4 sm:$0xff]   ;;  %v2493_v2 = vld [vmem:[#allocation7 + $0xcc] ss:$16 sps:$4 sm:$0xff]  }
  0x46   :  { %689 = vmatprep.subr.bf16.mxu1 %v2425_v8  ;;  %v2455_v29 = vld [vmem:[#allocation7 + $0x1c4] ss:$16 sps:$4 sm:$0xff]   ;;  %v2535_v33 = vld [vmem:[#allocation9] ss:$8 sps:$4 sm:$0xff]   ;;  %v2538_v37 = vld [vmem:[#allocation9 + $0x10] ss:$8 sps:$4 sm:$0xff]  }
  0x47   :  { %v2458_v31 = vld [vmem:[#allocation7 + $0x1e4] ss:$16 sps:$4 sm:$0xff]   ;;  %v2460_v35 = vld [vmem:[#allocation7 + $0x1e0] ss:$16 sps:$4 sm:$0xff]   ;;  %v2491_v6 = vld [vmem:[#allocation7 + $0xc8] ss:$16 sps:$4 sm:$0xff]  }
  0x48   :  { %v2533_v32 = vld [vmem:[#allocation9 + $0x4] ss:$8 sps:$4 sm:$0xff]   ;;  %v2812_v38 = vld [vmem:[#allocation4] ss:$8 sps:$4 sm:$0xff]   ;;  %v2814_v41 = vld [vmem:[#allocation4 + $0x14] ss:$8 sps:$4 sm:$0xff]  }
  0x49   :  { %690 = vmatpush1.bf16.msra.mxu1 %v2427_v9  ;;  %1744 = vmatprep.subr.bf16.mxu0 %v2533_v32  ;;  %v2539_v39 = vld [vmem:[#allocation9 + $0x24] ss:$8 sps:$4 sm:$0xff]   ;;  %v2541_v43 = vld [vmem:[#allocation9 + $0x20] ss:$8 sps:$4 sm:$0xff]   ;;  %v2542_v44 = vld [vmem:[#allocation9 + $0x34] ss:$8 sps:$4 sm:$0xff]  }
  0x4a   :  { %691 = vmatprep.subr.bf16.mxu1 %v2428_v10  ;;  %1745 = vmatpush1.bf16.msra.mxu0 %v2535_v33  ;;  %v2818_v46 = vld [vmem:[#allocation4 + $0x10] ss:$8 sps:$4 sm:$0xff]   ;;  %v2820_v51 = vld [vmem:[#allocation4 + $0x24] ss:$8 sps:$4 sm:$0xff]   ;;  %v2547_v53 = vld [vmem:[#allocation9 + $0x40] ss:$8 sps:$4 sm:$0xff]  }
  0x4b   :  { %1746 = vmatprep.subr.bf16.mxu0 %v2536_v34  ;;  %v2544_v49 = vld [vmem:[#allocation9 + $0x30] ss:$8 sps:$4 sm:$0xff]   ;;  %v2545_v52 = vld [vmem:[#allocation9 + $0x44] ss:$8 sps:$4 sm:$0xff]   ;;  %v2548_v54 = vld [vmem:[#allocation9 + $0x54] ss:$8 sps:$4 sm:$0xff]  }
  0x4c   :  { %v2550_v57 = vld [vmem:[#allocation9 + $0x50] ss:$8 sps:$4 sm:$0xff]   ;;  %v2824_v58 = vld [vmem:[#allocation4 + $0x20] ss:$8 sps:$4 sm:$0xff]   ;;  %v2551_v59 = vld [vmem:[#allocation9 + $0x64] ss:$8 sps:$4 sm:$0xff]  }
  0x4d   :  { %692 = vmatpush1.bf16.msra.mxu1 %v2430_v11  ;;  %v2826_v61 = vld [vmem:[#allocation4 + $0x34] ss:$8 sps:$4 sm:$0xff]   ;;  %v2553_v63 = vld [vmem:[#allocation9 + $0x60] ss:$8 sps:$4 sm:$0xff]   ;;  %v2556_v3 = vld [vmem:[#allocation9 + $0x70] ss:$8 sps:$4 sm:$0xff]  }
  0x4e   :  { %693 = vmatprep.subr.bf16.mxu1 %v2431_v12  ;;  %1747 = vmatpush1.bf16.msra.mxu0 %v2538_v37  ;;  %v2554_v0 = vld [vmem:[#allocation9 + $0x74] ss:$8 sps:$4 sm:$0xff]   ;;  %v2830_v4 = vld [vmem:[#allocation4 + $0x30] ss:$8 sps:$4 sm:$0xff]   ;;  %v2557_v5 = vld [vmem:[#allocation9 + $0x84] ss:$8 sps:$4 sm:$0xff]  }
  0x4f   :  { %1748 = vmatprep.subr.bf16.mxu0 %v2539_v39  ;;  %v2832_v7 = vld [vmem:[#allocation4 + $0x44] ss:$8 sps:$4 sm:$0xff]   ;;  %v2559_v9 = vld [vmem:[#allocation9 + $0x80] ss:$8 sps:$4 sm:$0xff]   ;;  %v2560_v10 = vld [vmem:[#allocation9 + $0x94] ss:$8 sps:$4 sm:$0xff]  }
  0x50   :  { %v2496_v8 = vld [vmem:[#allocation7 + $0xec] ss:$16 sps:$4 sm:$0xff]   ;;  %v2494_v11 = vld [vmem:[#allocation7 + $0xe8] ss:$16 sps:$4 sm:$0xff]  }
  0x51   :  { %694 = vmatpush1.bf16.msra.mxu1 %v2433_v14  ;;  %v2502_v12 = vld [vmem:[#allocation7 + $0x10c] ss:$16 sps:$4 sm:$0xff]   ;;  %v2562_v14 = vld [vmem:[#allocation9 + $0x90] ss:$8 sps:$4 sm:$0xff]   ;;  %v2517_v33 = vld [vmem:[#allocation4 + $0x60] ss:$8 sps:$4 sm:$0xff]  }
  0x52   :  { %695 = vmatprep.subr.bf16.mxu1 %v2434_v15  ;;  %1749 = vmatpush1.bf16.msra.mxu0 %v2541_v43  ;;  %v2836_v15 = vld [vmem:[#allocation4 + $0x40] ss:$8 sps:$4 sm:$0xff]   ;;  %v2520_v32 = vld [vmem:[#allocation7 + $0x18c] ss:$16 sps:$4 sm:$0xff]  }
  0x53   :  { %1750 = vmatprep.subr.bf16.mxu0 %v2542_v44  ;;  %v2518_v34 = vld [vmem:[#allocation7 + $0x188] ss:$16 sps:$4 sm:$0xff]   ;;  %v2529_v39 = vld [vmem:[#allocation7 + $0x1cc] ss:$16 sps:$4 sm:$0xff]  }
  0x54   :  { %v2521_v37 = vld [vmem:[#allocation7 + $0x1a8] ss:$16 sps:$4 sm:$0xff]   ;;  %v2532_v43 = vld [vmem:[#allocation7 + $0x1ec] ss:$16 sps:$4 sm:$0xff]  }
  0x55   :  { %696 = vmatpush1.bf16.msra.mxu1 %v2436_v16  ;;  %v2563_v16 = vld [vmem:[#allocation9 + $0xa4] ss:$8 sps:$4 sm:$0xff]   ;;  %v2530_v44 = vld [vmem:[#allocation7 + $0x1e8] ss:$16 sps:$4 sm:$0xff]  }
  0x56   :  { %697 = vmatprep.subr.bf16.mxu1 %v2437_v17  ;;  %1751 = vmatpush1.bf16.msra.mxu0 %v2544_v49  ;;  %v2500_v17 = vld [vmem:[#allocation7 + $0x108] ss:$16 sps:$4 sm:$0xff]   ;;  %v1104_v49 = vlaneseq }
  0x57   :  { %1752 = vmatprep.subr.bf16.mxu0 %v2545_v52  ;;  %v2865_v52 = vld [vmem:[%s3049_s2] sm:$0xf] }
  0x59   :  { %698 = vmatpush1.bf16.msra.mxu1 %v2439_v18  ;;  %v2838_v18 = vld [vmem:[#allocation4 + $0x54] ss:$8 sps:$4 sm:$0xff]  }
  0x5a   :  { %699 = vmatprep.subr.bf16.mxu1 %v2440_v19  ;;  %1753 = vmatpush1.bf16.msra.mxu0 %v2547_v53  ;;  %v2505_v19 = vld [vmem:[#allocation7 + $0x12c] ss:$16 sps:$4 sm:$0xff]  }
  0x5b   :  { %1754 = vmatprep.subr.bf16.mxu0 %v2548_v54 }
  0x5d   :  { %700 = vmatpush1.bf16.msra.mxu1 %v2442_v20  ;;  %v2565_v20 = vld [vmem:[#allocation9 + $0xa0] ss:$8 sps:$4 sm:$0xff]  }
  0x5e   :  { %701 = vmatprep.subr.bf16.mxu1 %v2443_v21  ;;  %1755 = vmatpush1.bf16.msra.mxu0 %v2550_v57  ;;  %v2566_v21 = vld [vmem:[#allocation9 + $0xb4] ss:$8 sps:$4 sm:$0xff]  }
  0x5f   :  { %1756 = vmatprep.subr.bf16.mxu0 %v2551_v59 }
  0x61   :  { %702 = vmatpush1.bf16.msra.mxu1 %v2445_v22  ;;  %v2503_v22 = vld [vmem:[#allocation7 + $0x128] ss:$16 sps:$4 sm:$0xff]  }
  0x62   :  { %703 = vmatprep.subr.bf16.mxu1 %v2446_v23  ;;  %1757 = vmatpush1.bf16.msra.mxu0 %v2553_v63  ;;  %v2511_v23 = vld [vmem:[#allocation7 + $0x14c] ss:$16 sps:$4 sm:$0xff]  }
  0x63   :  { %1758 = vmatprep.subr.bf16.mxu0 %v2554_v0 }
  0x65   :  { %704 = vmatpush1.bf16.msra.mxu1 %v2448_v24  ;;  %v2568_v24 = vld [vmem:[#allocation9 + $0xb0] ss:$8 sps:$4 sm:$0xff]  }
  0x66   :  { %705 = vmatprep.subr.bf16.mxu1 %v2449_v25  ;;  %1759 = vmatpush1.bf16.msra.mxu0 %v2556_v3  ;;  %v2842_v25 = vld [vmem:[#allocation4 + $0x50] ss:$8 sps:$4 sm:$0xff]  }
  0x67   :  { %1760 = vmatprep.subr.bf16.mxu0 %v2557_v5 }
  0x69   :  { %706 = vmatpush1.bf16.msra.mxu1 %v2451_v26  ;;  %v2569_v26 = vld [vmem:[#allocation9 + $0xc4] ss:$8 sps:$4 sm:$0xff]  }
  0x6a   :  { %707 = vmatprep.subr.bf16.mxu1 %v2452_v27  ;;  %1761 = vmatpush1.bf16.msra.mxu0 %v2559_v9  ;;  %v2509_v27 = vld [vmem:[#allocation7 + $0x148] ss:$16 sps:$4 sm:$0xff]  }
  0x6b   :  { %1762 = vmatprep.subr.bf16.mxu0 %v2560_v10 }
  0x6d   :  { %708 = vmatpush1.bf16.msra.mxu1 %v2454_v28  ;;  %v2515_v28 = vld [vmem:[#allocation4 + $0x64] ss:$8 sps:$4 sm:$0xff]  }
  0x6e   :  { %709 = vmatprep.subr.bf16.mxu1 %v2455_v29  ;;  %1763 = vmatpush1.bf16.msra.mxu0 %v2562_v14  ;;  %v2514_v29 = vld [vmem:[#allocation7 + $0x16c] ss:$16 sps:$4 sm:$0xff]  }
  0x6f   :  { %1764 = vmatprep.subr.bf16.mxu0 %v2563_v16  ;;  %v2581_v16 = vld [vmem:[#allocation9 + $0x100] ss:$8 sps:$4 sm:$0xff]  }
  0x71   :  { %710 = vmatpush1.bf16.msra.mxu1 %v2457_v30  ;;  %v2571_v30 = vld [vmem:[#allocation9 + $0xc0] ss:$8 sps:$4 sm:$0xff]  }
  0x72   :  { %711 = vmatprep.subr.bf16.mxu1 %v2458_v31  ;;  %1765 = vmatpush1.bf16.msra.mxu0 %v2565_v20  ;;  %v2512_v31 = vld [vmem:[#allocation7 + $0x168] ss:$16 sps:$4 sm:$0xff]   ;;  %v2586_v20 = vld [vmem:[#allocation9 + $0x114] ss:$8 sps:$4 sm:$0xff]  }
  0x73   :  { %1766 = vmatprep.subr.bf16.mxu0 %v2566_v21 }
  0x75   :  { %712 = vmatpush1.bf16.msra.mxu1 %v2460_v35  ;;  %v2524_v35 = vld [vmem:[#allocation4 + $0x74] ss:$8 sps:$4 sm:$0xff]  }
  0x76   :  { %794 = vmatprep.subr.bf16.mxu1 %v2466_v36  ;;  %1767 = vmatpush1.bf16.msra.mxu0 %v2568_v24  ;;  %v2523_v36 = vld [vmem:[#allocation7 + $0x1ac] ss:$16 sps:$4 sm:$0xff]  }
  0x77   :  { %1768 = vmatprep.subr.bf16.mxu0 %v2569_v26 }
  0x78   :  { %714 = vmatmul.mubr.bf16.vlgmr.msra.gmra.mrb[0].mxu1 %v2812_v38 }
  0x79   :  { %795 = vmatpush1.bf16.msra.mxu1 %v2464_v40  ;;  %723 = vmatprep.mubr.bf16.mxu1 %v2814_v41  ;;  %v2526_v40 = vld [vmem:[#allocation4 + $0x70] ss:$8 sps:$4 sm:$0xff]  }
  0x7a   :  { %796 = vmatprep.subr.bf16.mxu1 %v2469_v42  ;;  %1769 = vmatpush1.bf16.msra.mxu0 %v2571_v30  ;;  %v2527_v42 = vld [vmem:[#allocation7 + $0x1c8] ss:$16 sps:$4 sm:$0xff]  }
  0x7d   :  { %797 = vmatpush1.bf16.msra.mxu1 %v2467_v45  ;;  %v2572_v45 = vld [vmem:[#allocation9 + $0xd4] ss:$8 sps:$4 sm:$0xff]  }
  0x7e   :  { %798 = vmatprep.subr.bf16.mxu1 %v2475_v47  ;;  %v2574_v47 = vld [vmem:[#allocation9 + $0xd0] ss:$8 sps:$4 sm:$0xff]   ;;  %1770 = vmatprep.subr.bf16.mxu0 %v2572_v45 }
  0x7f   :  { %1771 = vmatpush1.bf16.msra.mxu0 %v2574_v47 }
  0x80   :  { %724 = vmatmul.mubr.bf16.gmra.mrb[4].mxu1 %v2818_v46 }
  0x81   :  { %799 = vmatpush1.bf16.msra.mxu1 %v2473_v48  ;;  %733 = vmatprep.mubr.bf16.mxu1 %v2820_v51  ;;  %v2575_v48 = vld [vmem:[#allocation9 + $0xe4] ss:$8 sps:$4 sm:$0xff]  }
  0x82   :  { %800 = vmatprep.subr.bf16.mxu1 %v2478_v50  ;;  %1772 = vmatprep.subr.bf16.mxu0 %v2575_v48  ;;  %v2857_v50 = vshrl.u32 %v1104_v49, 7  ;;  %v2595_v49 = vld [vmem:[#allocation9 + $0x144] ss:$8 sps:$4 sm:$0xff]  }
  0x84   :  { %v2868_v53 = vsub.s32 1, %v2857_v50 }
  0x85   :  { %801 = vmatpush1.bf16.msra.mxu1 %v2476_v55 }
  0x86   :  { %802 = vmatprep.subr.bf16.mxu1 %v2484_v56  ;;  %v2876_v55 = vrot.slane %v2865_v52, %v2868_v53 }
  0x88   :  { %734 = vmatmul.mubr.bf16.gmra.mrb[8].mxu1 %v2824_v58 }
  0x89   :  { %803 = vmatpush1.bf16.msra.mxu1 %v2482_v60  ;;  %743 = vmatprep.mubr.bf16.mxu1 %v2826_v61 }
  0x8a   :  { %804 = vmatprep.subr.bf16.mxu1 %v2487_v62 }
  0x8d   :  { %805 = vmatpush1.bf16.msra.mxu1 %v2485_v1 }
  0x8e   :  { %806 = vmatprep.subr.bf16.mxu1 %v2493_v2 }
  0x90   :  { %744 = vmatmul.mubr.bf16.gmra.mrb[12].mxu1 %v2830_v4 }
  0x91   :  { %807 = vmatpush1.bf16.msra.mxu1 %v2491_v6  ;;  %753 = vmatprep.mubr.bf16.mxu1 %v2832_v7 }
  0x92   :  { %808 = vmatprep.subr.bf16.mxu1 %v2496_v8 }
  0x95   :  { %809 = vmatpush1.bf16.msra.mxu1 %v2494_v11 }
  0x96   :  { %810 = vmatprep.subr.bf16.mxu1 %v2502_v12 }
  0x98   :  { %754 = vmatmul.mubr.bf16.gmra.mrb[16].mxu1 %v2836_v15 }
  0x99   :  { %811 = vmatpush1.bf16.msra.mxu1 %v2500_v17  ;;  %763 = vmatprep.mubr.bf16.mxu1 %v2838_v18 }
  0x9a   :  { %812 = vmatprep.subr.bf16.mxu1 %v2505_v19 }
  0x9d   :  { %813 = vmatpush1.bf16.msra.mxu1 %v2503_v22 }
  0x9e   :  { %814 = vmatprep.subr.bf16.mxu1 %v2511_v23 }
  0xa0   :  { %764 = vmatmul.mubr.bf16.gmra.mrb[20].mxu1 %v2842_v25 }
  0xa1   :  { %815 = vmatpush1.bf16.msra.mxu1 %v2509_v27  ;;  %773 = vmatprep.mubr.bf16.mxu1 %v2515_v28 }
  0xa2   :  { %816 = vmatprep.subr.bf16.mxu1 %v2514_v29 }
  0xa5   :  { %817 = vmatpush1.bf16.msra.mxu1 %v2512_v31 }
  0xa6   :  { %818 = vmatprep.subr.bf16.mxu1 %v2520_v32 }
  0xa8   :  { %774 = vmatmul.mubr.bf16.gmra.mrb[24].mxu1 %v2517_v33 }
  0xa9   :  { %819 = vmatpush1.bf16.msra.mxu1 %v2518_v34  ;;  %783 = vmatprep.mubr.bf16.mxu1 %v2524_v35 }
  0xaa   :  { %820 = vmatprep.subr.bf16.mxu1 %v2523_v36 }
  0xad   :  { %821 = vmatpush1.bf16.msra.mxu1 %v2521_v37 }
  0xae   :  { %822 = vmatprep.subr.bf16.mxu1 %v2529_v39  ;;  %v2587_v39 = vld [vmem:[#allocation9 + $0x120] ss:$8 sps:$4 sm:$0xff]  }
  0xb0   :  { %784 = vmatmul.mubr.bf16.gmra.mrb[28].mxu1 %v2526_v40 }
  0xb1   :  { %823 = vmatpush1.bf16.msra.mxu1 %v2527_v42  ;;  %826 = vmatprep.mubr.bf16.mxu1 %v2809_v13  ;;  %v2577_v13 = vld [vmem:[#allocation9 + $0xe0] ss:$8 sps:$4 sm:$0xff]  }
  0xb2   :  { %824 = vmatprep.subr.bf16.mxu1 %v2532_v43  ;;  %1773 = vmatpush1.bf16.msra.mxu0 %v2577_v13 }
  0xb5   :  { %825 = vmatpush1.bf16.msra.mxu1 %v2530_v44  ;;  %v2592_v44 = vld [vmem:[#allocation9 + $0x134] ss:$8 sps:$4 sm:$0xff]  }
  0xb8   :  { %827 = vmatmul.mubr.bf16.vlgmr.msra.gmra.mrb[32].mxu1 %v2812_v38  ;;  %v2578_v38 = vld [vmem:[#allocation9 + $0xf4] ss:$8 sps:$4 sm:$0xff]  }
  0xb9   :  { %836 = vmatprep.mubr.bf16.mxu1 %v2814_v41  ;;  %v2580_v41 = vld [vmem:[#allocation9 + $0xf0] ss:$8 sps:$4 sm:$0xff]   ;;  %1774 = vmatprep.subr.bf16.mxu0 %v2578_v38 }
  0xba   :  { %1775 = vmatpush1.bf16.msra.mxu0 %v2580_v41  ;;  %v2590_v38 = vld [vmem:[#allocation9 + $0x130] ss:$8 sps:$4 sm:$0xff]  }
  0xc0   :  { %837 = vmatmul.mubr.bf16.gmra.mrb[36].mxu1 %v2818_v46  ;;  %v2583_v46 = vld [vmem:[#allocation9 + $0x104] ss:$8 sps:$4 sm:$0xff]  }
  0xc1   :  { %846 = vmatprep.mubr.bf16.mxu1 %v2820_v51  ;;  %1857 = vmatprep.subr.bf16.mxu0 %v2583_v46  ;;  %v2860_v51 = vsub.s32 0, %v2857_v50 }
  0xc3   :  { %v2872_v54 = vrot.slane %v2865_v52, %v2860_v51 }
  0xc8   :  { %847 = vmatmul.mubr.bf16.gmra.mrb[40].mxu1 %v2824_v58 }
  0xc9   :  { %856 = vmatprep.mubr.bf16.mxu1 %v2826_v61 }
  0xd0   :  { %857 = vmatmul.mubr.bf16.gmra.mrb[44].mxu1 %v2830_v4 }
  0xd1   :  { %866 = vmatprep.mubr.bf16.mxu1 %v2832_v7 }
  0xd8   :  { %867 = vmatmul.mubr.bf16.gmra.mrb[48].mxu1 %v2836_v15 }
  0xd9   :  { %876 = vmatprep.mubr.bf16.mxu1 %v2838_v18 }
  0xe0   :  { %877 = vmatmul.mubr.bf16.gmra.mrb[52].mxu1 %v2842_v25  ;;  %v2584_v25 = vld [vmem:[#allocation9 + $0x110] ss:$8 sps:$4 sm:$0xff]  }
  0xe1   :  { %886 = vmatprep.mubr.bf16.mxu1 %v2515_v28  ;;  %v2589_v28 = vld [vmem:[#allocation9 + $0x124] ss:$8 sps:$4 sm:$0xff]  }
  0xe8   :  { %887 = vmatmul.mubr.bf16.gmra.mrb[56].mxu1 %v2517_v33 }
  0xe9   :  { %896 = vmatprep.mubr.bf16.mxu1 %v2524_v35 }
  0xf0   :  { %897 = vmatmul.mubr.bf16.gmra.mrb[60].mxu1 %v2526_v40 }
 0x14b   :  { %v715_v56 = vpop.f32.mrb[0].mxu1 }
 0x14c   :  { %v1124_v57 = vadd.f32 %v2872_v54, %v715_v56  ;;  %v717_v58 = vpop.f32.mrb[1].mxu1 }
 0x14d   :  { %v1125_v59 = vadd.f32 %v2876_v55, %v717_v58  ;;  %v719_v60 = vpop.f32.mrb[2].mxu1 }
 0x14e   :  { %v1188_v61 = vmul.f32 0.2, %v1124_v57  ;;  %v1128_v62 = vadd.f32 %v2872_v54, %v719_v60  ;;  %v721_v63 = vpop.f32.mrb[3].mxu1 }
 0x14f   :  { %v1189_v0 = vmul.f32 0.2, %v1125_v59  ;;  %v1129_v1 = vadd.f32 %v2876_v55, %v721_v63 }
 0x150   :  { %v1192_v2 = vmul.f32 0.2, %v1128_v62  ;;  %v1252_v4 = vmax.f32 %v1124_v57, %v1188_v61 }
 0x151   :  { %v1193_v3 = vmul.f32 0.2, %v1129_v1  ;;  %v1253_v7 = vmax.f32 %v1125_v59, %v1189_v0 }
 0x152   :  { %v1256_v5 = vmax.f32 %v1128_v62, %v1192_v2 }
 0x153   :  { %v725_v6 = vpop.f32.mrb[4].mxu1  ;;  %v1257_v8 = vmax.f32 %v1129_v1, %v1193_v3  ;;  %v2593_v1 = vld [vmem:[#allocation9 + $0x140] ss:$8 sps:$4 sm:$0xff]  }
 0x154   :  { %v1132_v9 = vadd.f32 %v2872_v54, %v725_v6  ;;  %v727_v10 = vpop.f32.mrb[5].mxu1  ;;  %v1316_v11 = vpack.c.bf16 %v1256_v5, %v1252_v4  ;;  %v2598_v5 = vld [vmem:[#allocation9 + $0x154] ss:$8 sps:$4 sm:$0xff]  }
 0x155   :  { %v1133_v12 = vadd.f32 %v2876_v55, %v727_v10  ;;  %v729_v14 = vpop.f32.mrb[6].mxu1  ;;  %v1317_v15 = vpack.c.bf16 %v1257_v8, %v1253_v7  ;;  %v2596_v10 = vld [vmem:[#allocation9 + $0x150] ss:$8 sps:$4 sm:$0xff]  }
 0x156   :  { %v1196_v17 = vmul.f32 0.2, %v1132_v9  ;;  %v1136_v18 = vadd.f32 %v2872_v54, %v729_v14  ;;  %v731_v19 = vpop.f32.mrb[7].mxu1  ;;  %v2601_v14 = vld [vmem:[#allocation9 + $0x164] ss:$8 sps:$4 sm:$0xff]  }
 0x157   :  { %v1197_v21 = vmul.f32 0.2, %v1133_v12  ;;  %v1137_v22 = vadd.f32 %v2876_v55, %v731_v19  ;;  %1776 = vmatprep.mubr.bf16.mxu0 %v1317_v15 }
 0x158   :  { %v1200_v23 = vmul.f32 0.2, %v1136_v18  ;;  %1777 = vmatmul.mubr.bf16.vlgmr.msra.gmra.mrb[0].mxu0 %v1316_v11  ;;  %v1260_v26 = vmax.f32 %v1132_v9, %v1196_v17 }
 0x159   :  { %v1201_v24 = vmul.f32 0.2, %v1137_v22  ;;  %1858 = vmatpush1.bf16.msra.mxu0 %v2581_v16  ;;  %v1261_v29 = vmax.f32 %v1133_v12, %v1197_v21 }
 0x15a   :  { %v1264_v27 = vmax.f32 %v1136_v18, %v1200_v23  ;;  %1859 = vmatprep.subr.bf16.mxu0 %v2586_v20 }
 0x15b   :  { %v1265_v30 = vmax.f32 %v1137_v22, %v1201_v24  ;;  %v735_v31 = vpop.f32.mrb[8].mxu1  ;;  %v2599_v24 = vld [vmem:[#allocation9 + $0x160] ss:$8 sps:$4 sm:$0xff]  }
 0x15c   :  { %v1140_v32 = vadd.f32 %v2872_v54, %v735_v31  ;;  %v737_v33 = vpop.f32.mrb[9].mxu1  ;;  %v1320_v34 = vpack.c.bf16 %v1264_v27, %v1260_v26 }
 0x15d   :  { %v1141_v35 = vadd.f32 %v2876_v55, %v737_v33  ;;  %v739_v36 = vpop.f32.mrb[10].mxu1  ;;  %1860 = vmatpush1.bf16.msra.mxu0 %v2584_v25  ;;  %v1321_v37 = vpack.c.bf16 %v1265_v30, %v1261_v29  ;;  %v2602_v33 = vld [vmem:[#allocation9 + $0x170] ss:$8 sps:$4 sm:$0xff]  }
 0x15e   :  { %v1204_v40 = vmul.f32 0.2, %v1140_v32  ;;  %v1144_v42 = vadd.f32 %v2872_v54, %v739_v36  ;;  %v741_v43 = vpop.f32.mrb[11].mxu1  ;;  %1861 = vmatprep.subr.bf16.mxu0 %v2589_v28  ;;  %v2604_v28 = vld [vmem:[#allocation9 + $0x174] ss:$8 sps:$4 sm:$0xff]  }
 0x15f   :  { %v1205_v45 = vmul.f32 0.2, %v1141_v35  ;;  %v1145_v47 = vadd.f32 %v2876_v55, %v741_v43  ;;  %1786 = vmatprep.mubr.bf16.mxu0 %v1321_v37  ;;  %v2607_v36 = vld [vmem:[#allocation9 + $0x184] ss:$8 sps:$4 sm:$0xff]  }
 0x160   :  { %v1208_v48 = vmul.f32 0.2, %v1144_v42  ;;  %1787 = vmatmul.mubr.bf16.gmra.mrb[4].mxu0 %v1320_v34  ;;  %v1268_v41 = vmax.f32 %v1140_v32, %v1204_v40 }
 0x161   :  { %v1209_v13 = vmul.f32 0.2, %v1145_v47  ;;  %1862 = vmatpush1.bf16.msra.mxu0 %v2587_v39  ;;  %v1269_v56 = vmax.f32 %v1141_v35, %v1205_v45 }
 0x162   :  { %v1272_v46 = vmax.f32 %v1144_v42, %v1208_v48  ;;  %1863 = vmatprep.subr.bf16.mxu0 %v2592_v44 }
 0x163   :  { %v1273_v57 = vmax.f32 %v1145_v47, %v1209_v13  ;;  %v745_v58 = vpop.f32.mrb[12].mxu1  ;;  %v2605_v13 = vld [vmem:[#allocation9 + $0x180] ss:$8 sps:$4 sm:$0xff]  }
 0x164   :  { %v1148_v59 = vadd.f32 %v2872_v54, %v745_v58  ;;  %v747_v60 = vpop.f32.mrb[13].mxu1  ;;  %v1324_v61 = vpack.c.bf16 %v1272_v46, %v1268_v41 }
 0x165   :  { %v1149_v62 = vadd.f32 %v2876_v55, %v747_v60  ;;  %v749_v63 = vpop.f32.mrb[14].mxu1  ;;  %1864 = vmatpush1.bf16.msra.mxu0 %v2590_v38  ;;  %v1325_v0 = vpack.c.bf16 %v1273_v57, %v1269_v56  ;;  %v2608_v60 = vld [vmem:[#allocation9 + $0x190] ss:$8 sps:$4 sm:$0xff]  }
 0x166   :  { %v1212_v2 = vmul.f32 0.2, %v1148_v59  ;;  %v1152_v3 = vadd.f32 %v2872_v54, %v749_v63  ;;  %v751_v4 = vpop.f32.mrb[15].mxu1  ;;  %1865 = vmatprep.subr.bf16.mxu0 %v2595_v49  ;;  %v2610_v49 = vld [vmem:[#allocation9 + $0x194] ss:$8 sps:$4 sm:$0xff]  }
 0x167   :  { %v1213_v6 = vmul.f32 0.2, %v1149_v62  ;;  %v1153_v7 = vadd.f32 %v2876_v55, %v751_v4  ;;  %1796 = vmatprep.mubr.bf16.mxu0 %v1325_v0  ;;  %v2613_v63 = vld [vmem:[#allocation9 + $0x1a4] ss:$8 sps:$4 sm:$0xff]  }
 0x168   :  { %v1216_v8 = vmul.f32 0.2, %v1152_v3  ;;  %1797 = vmatmul.mubr.bf16.gmra.mrb[8].mxu0 %v1324_v61  ;;  %v1276_v11 = vmax.f32 %v1148_v59, %v1212_v2 }
 0x169   :  { %v1217_v9 = vmul.f32 0.2, %v1153_v7  ;;  %1866 = vmatpush1.bf16.msra.mxu0 %v2593_v1  ;;  %v1277_v15 = vmax.f32 %v1149_v62, %v1213_v6 }
 0x16a   :  { %v1280_v12 = vmax.f32 %v1152_v3, %v1216_v8  ;;  %1867 = vmatprep.subr.bf16.mxu0 %v2598_v5 }
 0x16b   :  { %v1281_v16 = vmax.f32 %v1153_v7, %v1217_v9  ;;  %v755_v17 = vpop.f32.mrb[16].mxu1  ;;  %v2611_v9 = vld [vmem:[#allocation9 + $0x1a0] ss:$8 sps:$4 sm:$0xff]  }
 0x16c   :  { %v1156_v18 = vadd.f32 %v2872_v54, %v755_v17  ;;  %v757_v19 = vpop.f32.mrb[17].mxu1  ;;  %v1328_v20 = vpack.c.bf16 %v1280_v12, %v1276_v11 }
 0x16d   :  { %v1157_v21 = vadd.f32 %v2876_v55, %v757_v19  ;;  %v759_v22 = vpop.f32.mrb[18].mxu1  ;;  %1868 = vmatpush1.bf16.msra.mxu0 %v2596_v10  ;;  %v1329_v23 = vpack.c.bf16 %v1281_v16, %v1277_v15  ;;  %v2614_v19 = vld [vmem:[#allocation9 + $0x1b0] ss:$8 sps:$4 sm:$0xff]  }
 0x16e   :  { %v1220_v25 = vmul.f32 0.2, %v1156_v18  ;;  %v1160_v26 = vadd.f32 %v2872_v54, %v759_v22  ;;  %v761_v27 = vpop.f32.mrb[19].mxu1  ;;  %1869 = vmatprep.subr.bf16.mxu0 %v2601_v14  ;;  %v2616_v14 = vld [vmem:[#allocation9 + $0x1b4] ss:$8 sps:$4 sm:$0xff]  }
 0x16f   :  { %v1221_v29 = vmul.f32 0.2, %v1157_v21  ;;  %v1161_v30 = vadd.f32 %v2876_v55, %v761_v27  ;;  %1806 = vmatprep.mubr.bf16.mxu0 %v1329_v23  ;;  %v2619_v22 = vld [vmem:[#allocation9 + $0x1c4] ss:$8 sps:$4 sm:$0xff]  }
 0x170   :  { %v1224_v31 = vmul.f32 0.2, %v1160_v26  ;;  %1807 = vmatmul.mubr.bf16.gmra.mrb[12].mxu0 %v1328_v20  ;;  %v1284_v34 = vmax.f32 %v1156_v18, %v1220_v25 }
 0x171   :  { %v1225_v32 = vmul.f32 0.2, %v1161_v30  ;;  %1870 = vmatpush1.bf16.msra.mxu0 %v2599_v24  ;;  %v1285_v37 = vmax.f32 %v1157_v21, %v1221_v29  ;;  %v1114_v29 = vsub.s32 2, %v2857_v50 }
 0x172   :  { %v1288_v35 = vmax.f32 %v1160_v26, %v1224_v31  ;;  %1871 = vmatprep.subr.bf16.mxu0 %v2604_v28 }
 0x173   :  { %v1289_v39 = vmax.f32 %v1161_v30, %v1225_v32  ;;  %v765_v40 = vpop.f32.mrb[20].mxu1 }
 0x174   :  { %v1164_v42 = vadd.f32 %v2872_v54, %v765_v40  ;;  %v767_v43 = vpop.f32.mrb[21].mxu1  ;;  %v1332_v44 = vpack.c.bf16 %v1288_v35, %v1284_v34  ;;  %v1118_v34 = vsub.s32 3, %v2857_v50  ;;  %v2620_v50 = vld [vmem:[#allocation9 + $0x1d0] ss:$8 sps:$4 sm:$0xff]  }
 0x175   :  { %v1165_v45 = vadd.f32 %v2876_v55, %v767_v43  ;;  %v769_v47 = vpop.f32.mrb[22].mxu1  ;;  %1872 = vmatpush1.bf16.msra.mxu0 %v2602_v33  ;;  %v1333_v48 = vpack.c.bf16 %v1289_v39, %v1285_v37  ;;  %v2617_v33 = vld [vmem:[#allocation9 + $0x1c0] ss:$8 sps:$4 sm:$0xff]   ;;  %v2622_v39 = vld [vmem:[#allocation9 + $0x1d4] ss:$8 sps:$4 sm:$0xff]  }
 0x176   :  { %v1228_v38 = vmul.f32 0.2, %v1164_v42  ;;  %v1168_v41 = vadd.f32 %v2872_v54, %v769_v47  ;;  %v771_v46 = vpop.f32.mrb[23].mxu1  ;;  %1873 = vmatprep.subr.bf16.mxu0 %v2607_v36  ;;  %v2916_v47 = vrot.slane %v2865_v52, %v1118_v34 }
 0x177   :  { %v1229_v56 = vmul.f32 0.2, %v1165_v45  ;;  %v1169_v57 = vadd.f32 %v2876_v55, %v771_v46  ;;  %1816 = vmatprep.mubr.bf16.mxu0 %v1333_v48 }
 0x178   :  { %v1232_v58 = vmul.f32 0.2, %v1168_v41  ;;  %1817 = vmatmul.mubr.bf16.gmra.mrb[16].mxu0 %v1332_v44  ;;  %v1292_v61 = vmax.f32 %v1164_v42, %v1228_v38  ;;  %v2913_v44 = vrot.slane %v2865_v52, %v1114_v29 }
 0x179   :  { %v1233_v59 = vmul.f32 0.2, %v1169_v57  ;;  %1874 = vmatpush1.bf16.msra.mxu0 %v2605_v13  ;;  %v1293_v0 = vmax.f32 %v1165_v45, %v1229_v56  ;;  %v2625_v13 = vld [vmem:[#allocation9 + $0x1e4] ss:$8 sps:$4 sm:$0xff]  }
 0x17a   :  { %v1296_v62 = vmax.f32 %v1168_v41, %v1232_v58  ;;  %1875 = vmatprep.subr.bf16.mxu0 %v2610_v49 }
 0x17b   :  { %v1297_v1 = vmax.f32 %v1169_v57, %v1233_v59  ;;  %v775_v2 = vpop.f32.mrb[24].mxu1 }
 0x17c   :  { %v1172_v3 = vadd.f32 %v2872_v54, %v775_v2  ;;  %v777_v4 = vpop.f32.mrb[25].mxu1  ;;  %v1336_v5 = vpack.c.bf16 %v1296_v62, %v1292_v61 }
 0x17d   :  { %v1173_v6 = vadd.f32 %v2876_v55, %v777_v4  ;;  %v779_v7 = vpop.f32.mrb[26].mxu1  ;;  %1876 = vmatpush1.bf16.msra.mxu0 %v2608_v60  ;;  %v1337_v8 = vpack.c.bf16 %v1297_v1, %v1293_v0  ;;  %v2623_v60 = vld [vmem:[#allocation9 + $0x1e0] ss:$8 sps:$4 sm:$0xff]   ;;  %v2626_v4 = vld [vmem:[#allocation9 + $0x1f0] ss:$8 sps:$4 sm:$0xff]  }
 0x17e   :  { %v1236_v10 = vmul.f32 0.2, %v1172_v3  ;;  %v1176_v11 = vadd.f32 %v2872_v54, %v779_v7  ;;  %v781_v12 = vpop.f32.mrb[27].mxu1  ;;  %1877 = vmatprep.subr.bf16.mxu0 %v2613_v63  ;;  %v2628_v63 = vld [vmem:[#allocation9 + $0x1f4] ss:$8 sps:$4 sm:$0xff]  }
 0x17f   :  { %v1237_v15 = vmul.f32 0.2, %v1173_v6  ;;  %v1177_v16 = vadd.f32 %v2876_v55, %v781_v12  ;;  %1826 = vmatprep.mubr.bf16.mxu0 %v1337_v8 }
 0x180   :  { %v1240_v17 = vmul.f32 0.2, %v1176_v11  ;;  %1827 = vmatmul.mubr.bf16.gmra.mrb[20].mxu0 %v1336_v5  ;;  %v1300_v20 = vmax.f32 %v1172_v3, %v1236_v10 }
 0x181   :  { %v1241_v18 = vmul.f32 0.2, %v1177_v16  ;;  %1878 = vmatpush1.bf16.msra.mxu0 %v2611_v9  ;;  %v1301_v23 = vmax.f32 %v1173_v6, %v1237_v15 }
 0x182   :  { %v1304_v21 = vmax.f32 %v1176_v11, %v1240_v17  ;;  %1879 = vmatprep.subr.bf16.mxu0 %v2616_v14 }
 0x183   :  { %v1305_v24 = vmax.f32 %v1177_v16, %v1241_v18  ;;  %v785_v25 = vpop.f32.mrb[28].mxu1 }
 0x184   :  { %v1180_v26 = vadd.f32 %v2872_v54, %v785_v25  ;;  %v787_v27 = vpop.f32.mrb[29].mxu1  ;;  %v1340_v28 = vpack.c.bf16 %v1304_v21, %v1300_v20 }
 0x185   :  { %v1181_v30 = vadd.f32 %v2876_v55, %v787_v27  ;;  %v789_v31 = vpop.f32.mrb[30].mxu1  ;;  %1880 = vmatpush1.bf16.msra.mxu0 %v2614_v19  ;;  %v1341_v32 = vpack.c.bf16 %v1305_v24, %v1301_v23 }
 0x186   :  { %v1244_v35 = vmul.f32 0.2, %v1180_v26  ;;  %v1184_v36 = vadd.f32 %v2872_v54, %v789_v31  ;;  %v791_v37 = vpop.f32.mrb[31].mxu1  ;;  %1881 = vmatprep.subr.bf16.mxu0 %v2619_v22 }
 0x187   :  { %v1245_v40 = vmul.f32 0.2, %v1181_v30  ;;  %v1185_v42 = vadd.f32 %v2876_v55, %v791_v37  ;;  %1836 = vmatprep.mubr.bf16.mxu0 %v1341_v32 }
 0x188   :  { %v1248_v43 = vmul.f32 0.2, %v1184_v36  ;;  %1837 = vmatmul.mubr.bf16.gmra.mrb[24].mxu0 %v1340_v28  ;;  %v1308_v48 = vmax.f32 %v1180_v26, %v1244_v35 }
 0x189   :  { %v1249_v45 = vmul.f32 0.2, %v1185_v42  ;;  %1882 = vmatpush1.bf16.msra.mxu0 %v2617_v33  ;;  %v1309_v38 = vmax.f32 %v1181_v30, %v1245_v40 }
 0x18a   :  { %v1312_v54 = vmax.f32 %v1184_v36, %v1248_v43  ;;  %1883 = vmatprep.subr.bf16.mxu0 %v2622_v39 }
 0x18b   :  { %v1313_v41 = vmax.f32 %v1185_v42, %v1249_v45  ;;  %v828_v46 = vpop.f32.mrb[32].mxu1 }
 0x18c   :  { %v1126_v55 = vadd.f32 %v2913_v44, %v828_v46  ;;  %v830_v49 = vpop.f32.mrb[33].mxu1  ;;  %v1344_v56 = vpack.c.bf16 %v1312_v54, %v1308_v48 }
 0x18d   :  { %v1127_v57 = vadd.f32 %v2916_v47, %v830_v49  ;;  %v832_v58 = vpop.f32.mrb[34].mxu1  ;;  %1884 = vmatpush1.bf16.msra.mxu0 %v2620_v50  ;;  %v1345_v59 = vpack.c.bf16 %v1313_v41, %v1309_v38 }
 0x18e   :  { %v1190_v52 = vmul.f32 0.2, %v1126_v55  ;;  %v1130_v61 = vadd.f32 %v2913_v44, %v832_v58  ;;  %v834_v62 = vpop.f32.mrb[35].mxu1  ;;  %1885 = vmatprep.subr.bf16.mxu0 %v2625_v13 }
 0x18f   :  { %v1191_v0 = vmul.f32 0.2, %v1127_v57  ;;  %v1131_v1 = vadd.f32 %v2916_v47, %v834_v62  ;;  %1846 = vmatprep.mubr.bf16.mxu0 %v1345_v59 }
 0x190   :  { %v1194_v2 = vmul.f32 0.2, %v1130_v61  ;;  %1847 = vmatmul.mubr.bf16.gmra.mrb[28].mxu0 %v1344_v56  ;;  %v1254_v5 = vmax.f32 %v1126_v55, %v1190_v52 }
 0x191   :  { %v1195_v3 = vmul.f32 0.2, %v1131_v1  ;;  %1886 = vmatpush1.bf16.msra.mxu0 %v2623_v60  ;;  %v1255_v7 = vmax.f32 %v1127_v57, %v1191_v0 }
 0x192   :  { %v1258_v6 = vmax.f32 %v1130_v61, %v1194_v2  ;;  %1887 = vmatprep.subr.bf16.mxu0 %v2628_v63 }
 0x193   :  { %v1259_v8 = vmax.f32 %v1131_v1, %v1195_v3  ;;  %v838_v9 = vpop.f32.mrb[36].mxu1 }
 0x194   :  { %v1318_v10 = vpack.c.bf16 %v1258_v6, %v1254_v5  ;;  %v1134_v11 = vadd.f32 %v2913_v44, %v838_v9  ;;  %v840_v12 = vpop.f32.mrb[37].mxu1 }
 0x195   :  { %v1135_v14 = vadd.f32 %v2916_v47, %v840_v12  ;;  %v842_v15 = vpop.f32.mrb[38].mxu1  ;;  %1888 = vmatpush1.bf16.msra.mxu0 %v2626_v4  ;;  %v1319_v16 = vpack.c.bf16 %v1259_v8, %v1255_v7 }
 0x196   :  { %v1198_v17 = vmul.f32 0.2, %v1134_v11  ;;  %v1138_v18 = vadd.f32 %v2913_v44, %v842_v15  ;;  %v844_v19 = vpop.f32.mrb[39].mxu1 }
 0x197   :  { %v1199_v20 = vmul.f32 0.2, %v1135_v14  ;;  %v1139_v21 = vadd.f32 %v2916_v47, %v844_v19  ;;  %1889 = vmatprep.mubr.bf16.mxu0 %v1319_v16 }
 0x198   :  { %v1202_v22 = vmul.f32 0.2, %v1138_v18  ;;  %1890 = vmatmul.mubr.bf16.vlgmr.msra.gmra.mrb[0].mxu0 %v1318_v10  ;;  %v1262_v24 = vmax.f32 %v1134_v11, %v1198_v17 }
 0x199   :  { %v1203_v23 = vmul.f32 0.2, %v1139_v21  ;;  %v1263_v26 = vmax.f32 %v1135_v14, %v1199_v20 }
 0x19a   :  { %v1266_v25 = vmax.f32 %v1138_v18, %v1202_v22 }
 0x19b   :  { %v1267_v27 = vmax.f32 %v1139_v21, %v1203_v23  ;;  %v848_v28 = vpop.f32.mrb[40].mxu1 }
 0x19c   :  { %v1142_v29 = vadd.f32 %v2913_v44, %v848_v28  ;;  %v850_v30 = vpop.f32.mrb[41].mxu1  ;;  %v1322_v31 = vpack.c.bf16 %v1266_v25, %v1262_v24 }
 0x19d   :  { %v1143_v32 = vadd.f32 %v2916_v47, %v850_v30  ;;  %v852_v33 = vpop.f32.mrb[42].mxu1  ;;  %v1323_v34 = vpack.c.bf16 %v1267_v27, %v1263_v26 }
 0x19e   :  { %v1206_v35 = vmul.f32 0.2, %v1142_v29  ;;  %v1146_v36 = vadd.f32 %v2913_v44, %v852_v33  ;;  %v854_v37 = vpop.f32.mrb[43].mxu1 }
 0x19f   :  { %v1207_v39 = vmul.f32 0.2, %v1143_v32  ;;  %v1147_v40 = vadd.f32 %v2916_v47, %v854_v37  ;;  %1899 = vmatprep.mubr.bf16.mxu0 %v1323_v34 }
 0x1a0   :  { %v1210_v42 = vmul.f32 0.2, %v1146_v36  ;;  %1900 = vmatmul.mubr.bf16.gmra.mrb[4].mxu0 %v1322_v31  ;;  %v1270_v45 = vmax.f32 %v1142_v29, %v1206_v35 }
 0x1a1   :  { %v1211_v43 = vmul.f32 0.2, %v1147_v40  ;;  %v1271_v48 = vmax.f32 %v1143_v32, %v1207_v39 }
 0x1a2   :  { %v1274_v50 = vmax.f32 %v1146_v36, %v1210_v42 }
 0x1a3   :  { %v1275_v54 = vmax.f32 %v1147_v40, %v1211_v43  ;;  %v858_v13 = vpop.f32.mrb[44].mxu1 }
 0x1a4   :  { %v1150_v38 = vadd.f32 %v2913_v44, %v858_v13  ;;  %v860_v41 = vpop.f32.mrb[45].mxu1  ;;  %v1326_v46 = vpack.c.bf16 %v1274_v50, %v1270_v45 }
 0x1a5   :  { %v1151_v55 = vadd.f32 %v2916_v47, %v860_v41  ;;  %v862_v49 = vpop.f32.mrb[46].mxu1  ;;  %v1327_v56 = vpack.c.bf16 %v1275_v54, %v1271_v48 }
 0x1a6   :  { %v1214_v57 = vmul.f32 0.2, %v1150_v38  ;;  %v1154_v58 = vadd.f32 %v2913_v44, %v862_v49  ;;  %v864_v59 = vpop.f32.mrb[47].mxu1 }
 0x1a7   :  { %v1215_v60 = vmul.f32 0.2, %v1151_v55  ;;  %v1155_v52 = vadd.f32 %v2916_v47, %v864_v59  ;;  %1909 = vmatprep.mubr.bf16.mxu0 %v1327_v56 }
 0x1a8   :  { %v1218_v61 = vmul.f32 0.2, %v1154_v58  ;;  %1910 = vmatmul.mubr.bf16.gmra.mrb[8].mxu0 %v1326_v46  ;;  %v1278_v63 = vmax.f32 %v1150_v38, %v1214_v57 }
 0x1a9   :  { %v1219_v62 = vmul.f32 0.2, %v1155_v52  ;;  %v1279_v1 = vmax.f32 %v1151_v55, %v1215_v60 }
 0x1aa   :  { %v1282_v0 = vmax.f32 %v1154_v58, %v1218_v61 }
 0x1ab   :  { %v1283_v2 = vmax.f32 %v1155_v52, %v1219_v62  ;;  %v868_v3 = vpop.f32.mrb[48].mxu1 }
 0x1ac   :  { %v1158_v4 = vadd.f32 %v2913_v44, %v868_v3  ;;  %v870_v5 = vpop.f32.mrb[49].mxu1  ;;  %v1330_v6 = vpack.c.bf16 %v1282_v0, %v1278_v63 }
 0x1ad   :  { %v1159_v7 = vadd.f32 %v2916_v47, %v870_v5  ;;  %v872_v8 = vpop.f32.mrb[50].mxu1  ;;  %v1331_v9 = vpack.c.bf16 %v1283_v2, %v1279_v1 }
 0x1ae   :  { %v1222_v10 = vmul.f32 0.2, %v1158_v4  ;;  %v1162_v11 = vadd.f32 %v2913_v44, %v872_v8  ;;  %v874_v12 = vpop.f32.mrb[51].mxu1 }
 0x1af   :  { %v1223_v14 = vmul.f32 0.2, %v1159_v7  ;;  %v1163_v15 = vadd.f32 %v2916_v47, %v874_v12  ;;  %1919 = vmatprep.mubr.bf16.mxu0 %v1331_v9 }
 0x1b0   :  { %v1226_v16 = vmul.f32 0.2, %v1162_v11  ;;  %1920 = vmatmul.mubr.bf16.gmra.mrb[12].mxu0 %v1330_v6  ;;  %v1286_v18 = vmax.f32 %v1158_v4, %v1222_v10 }
 0x1b1   :  { %v1227_v17 = vmul.f32 0.2, %v1163_v15  ;;  %v1287_v20 = vmax.f32 %v1159_v7, %v1223_v14 }
 0x1b2   :  { %v1290_v19 = vmax.f32 %v1162_v11, %v1226_v16 }
 0x1b3   :  { %v1291_v21 = vmax.f32 %v1163_v15, %v1227_v17  ;;  %v878_v22 = vpop.f32.mrb[52].mxu1 }
 0x1b4   :  { %v1166_v23 = vadd.f32 %v2913_v44, %v878_v22  ;;  %v880_v24 = vpop.f32.mrb[53].mxu1  ;;  %v1334_v25 = vpack.c.bf16 %v1290_v19, %v1286_v18 }
 0x1b5   :  { %v1167_v26 = vadd.f32 %v2916_v47, %v880_v24  ;;  %v882_v27 = vpop.f32.mrb[54].mxu1  ;;  %v1335_v28 = vpack.c.bf16 %v1291_v21, %v1287_v20  ;;  %v2034_v20 = vld [vmem:[%s3052_s5] sm:$0x3] }
 0x1b6   :  { %v1230_v29 = vmul.f32 0.2, %v1166_v23  ;;  %v1170_v30 = vadd.f32 %v2913_v44, %v882_v27  ;;  %v884_v31 = vpop.f32.mrb[55].mxu1 }
 0x1b7   :  { %v1231_v32 = vmul.f32 0.2, %v1167_v26  ;;  %v1171_v33 = vadd.f32 %v2916_v47, %v884_v31  ;;  %1929 = vmatprep.mubr.bf16.mxu0 %v1335_v28  ;;  %v2966_v28 = vrot.slane %v2034_v20, %v2860_v51  ;;  %v2970_v31 = vrot.slane %v2034_v20, %v2868_v53 }
 0x1b8   :  { %v1234_v34 = vmul.f32 0.2, %v1170_v30  ;;  %1930 = vmatmul.mubr.bf16.gmra.mrb[16].mxu0 %v1334_v25  ;;  %v1294_v36 = vmax.f32 %v1166_v23, %v1230_v29 }
 0x1b9   :  { %v1235_v35 = vmul.f32 0.2, %v1171_v33  ;;  %v1295_v39 = vmax.f32 %v1167_v26, %v1231_v32 }
 0x1ba   :  { %v1298_v37 = vmax.f32 %v1170_v30, %v1234_v34 }
 0x1bb   :  { %v1299_v40 = vmax.f32 %v1171_v33, %v1235_v35  ;;  %v888_v42 = vpop.f32.mrb[56].mxu1 }
 0x1bc   :  { %v1174_v43 = vadd.f32 %v2913_v44, %v888_v42  ;;  %v890_v45 = vpop.f32.mrb[57].mxu1  ;;  %v1338_v50 = vpack.c.bf16 %v1298_v37, %v1294_v36 }
 0x1bd   :  { %v1175_v48 = vadd.f32 %v2916_v47, %v890_v45  ;;  %v892_v54 = vpop.f32.mrb[58].mxu1  ;;  %v1339_v13 = vpack.c.bf16 %v1299_v40, %v1295_v39 }
 0x1be   :  { %v1238_v38 = vmul.f32 0.2, %v1174_v43  ;;  %v1178_v41 = vadd.f32 %v2913_v44, %v892_v54  ;;  %v894_v46 = vpop.f32.mrb[59].mxu1 }
 0x1bf   :  { %v1239_v55 = vmul.f32 0.2, %v1175_v48  ;;  %v1179_v49 = vadd.f32 %v2916_v47, %v894_v46  ;;  %1939 = vmatprep.mubr.bf16.mxu0 %v1339_v13 }
 0x1c0   :  { %v1242_v56 = vmul.f32 0.2, %v1178_v41  ;;  %1940 = vmatmul.mubr.bf16.gmra.mrb[20].mxu0 %v1338_v50  ;;  %v1302_v58 = vmax.f32 %v1174_v43, %v1238_v38 }
 0x1c1   :  { %v1243_v57 = vmul.f32 0.2, %v1179_v49  ;;  %v1303_v60 = vmax.f32 %v1175_v48, %v1239_v55 }
 0x1c2   :  { %v1306_v59 = vmax.f32 %v1178_v41, %v1242_v56 }
 0x1c3   :  { %v1307_v52 = vmax.f32 %v1179_v49, %v1243_v57  ;;  %v898_v61 = vpop.f32.mrb[60].mxu1 }
 0x1c4   :  { %v1182_v62 = vadd.f32 %v2913_v44, %v898_v61  ;;  %v900_v63 = vpop.f32.mrb[61].mxu1  ;;  %v1342_v0 = vpack.c.bf16 %v1306_v59, %v1302_v58 }
 0x1c5   :  { %v1183_v1 = vadd.f32 %v2916_v47, %v900_v63  ;;  %v902_v2 = vpop.f32.mrb[62].mxu1  ;;  %v1343_v3 = vpack.c.bf16 %v1307_v52, %v1303_v60 }
 0x1c6   :  { %v1246_v4 = vmul.f32 0.2, %v1182_v62  ;;  %v1186_v5 = vadd.f32 %v2913_v44, %v902_v2  ;;  %v904_v6 = vpop.f32.mrb[63].mxu1  ;;  %v1412_v44 = vld [vmem:[%s3051_s4] sm:$0x3] }
 0x1c7   :  { %v1247_v7 = vmul.f32 0.2, %v1183_v1  ;;  %v1187_v8 = vadd.f32 %v2916_v47, %v904_v6  ;;  %1949 = vmatprep.mubr.bf16.mxu0 %v1343_v3  ;;  %v2954_v18 = vrot.slane %v1412_v44, %v2860_v51  ;;  %v2957_v47 = vrot.slane %v1412_v44, %v2868_v53 }
 0x1c8   :  { %v1250_v9 = vmul.f32 0.2, %v1186_v5  ;;  %1950 = vmatmul.mubr.bf16.gmra.mrb[24].mxu0 %v1342_v0  ;;  %v1310_v11 = vmax.f32 %v1182_v62, %v1246_v4 }
 0x1c9   :  { %v1251_v10 = vmul.f32 0.2, %v1187_v8  ;;  %v1311_v14 = vmax.f32 %v1183_v1, %v1247_v7 }
 0x1ca   :  { %v1314_v12 = vmax.f32 %v1186_v5, %v1250_v9 }
 0x1cb   :  { %v1315_v15 = vmax.f32 %v1187_v8, %v1251_v10 }
 0x1cc   :  { %v1346_v16 = vpack.c.bf16 %v1314_v12, %v1310_v11 }
 0x1cd   :  { %v1347_v17 = vpack.c.bf16 %v1315_v15, %v1311_v14 }
 0x1cf   :  { %1959 = vmatprep.mubr.bf16.mxu0 %v1347_v17 }
 0x1d0   :  { %1960 = vmatmul.mubr.bf16.gmra.mrb[28].mxu0 %v1346_v16 }
 0x26b   :  { %v1891_v19 = vpop.f32.mrb[0].mxu0 }
 0x26c   :  { %v2341_v21 = vadd.f32 %v1891_v19, %v2954_v18  ;;  %v1893_v22 = vpop.f32.mrb[1].mxu0 }
 0x26d   :  { %v2342_v23 = vadd.f32 %v1893_v22, %v2957_v47  ;;  %v1895_v24 = vpop.f32.mrb[2].mxu0 }
 0x26e   :  { %v1970_v25 = vmul.f32 0.2, %v2341_v21  ;;  %v2343_v26 = vadd.f32 %v1895_v24, %v2954_v18  ;;  %v1897_v27 = vpop.f32.mrb[3].mxu0 }
 0x26f   :  { %v1971_v29 = vmul.f32 0.2, %v2342_v23  ;;  %v2344_v30 = vadd.f32 %v1897_v27, %v2957_v47 }
 0x270   :  { %v2002_v32 = vmax.f32 %v2341_v21, %v1970_v25  ;;  %v1972_v33 = vmul.f32 0.2, %v2343_v26 }
 0x271   :  { %v2003_v34 = vmax.f32 %v2342_v23, %v1971_v29  ;;  %v1973_v35 = vmul.f32 0.2, %v2344_v30 }
 0x272   :  { %v2004_v36 = vmax.f32 %v2343_v26, %v1972_v33  ;;  %v2046_v37 = vmul.f32 %v2966_v28, %v2002_v32 }
 0x273   :  { %v2005_v39 = vmax.f32 %v2344_v30, %v1973_v35  ;;  %v1901_v40 = vpop.f32.mrb[4].mxu0  ;;  %v2047_v42 = vmul.f32 %v2970_v31, %v2003_v34 }
 0x274   :  { %v2345_v51 = vadd.f32 %v1901_v40, %v2954_v18  ;;  %v1903_v43 = vpop.f32.mrb[5].mxu0  ;;  %v2048_v45 = vmul.f32 %v2966_v28, %v2004_v36 }
 0x275   :  { %v2346_v50 = vadd.f32 %v1903_v43, %v2957_v47  ;;  %v1905_v53 = vpop.f32.mrb[6].mxu0  ;;  %v2078_v48 = vadd.f32 %v2047_v42, %v2046_v37  ;;  %v2049_v54 = vmul.f32 %v2970_v31, %v2005_v39 }
 0x276   :  { %v1974_v13 = vmul.f32 0.2, %v2345_v51  ;;  %v2347_v38 = vadd.f32 %v1905_v53, %v2954_v18  ;;  %v1907_v41 = vpop.f32.mrb[7].mxu0 }
 0x277   :  { %v1975_v46 = vmul.f32 0.2, %v2346_v50  ;;  %v2348_v55 = vadd.f32 %v1907_v41, %v2957_v47  ;;  %2079 = vadd.xlane.f32.xlu0 %v2078_v48  ;;  %v2081_v49 = vadd.f32 %v2049_v54, %v2048_v45 }
 0x278   :  { %v2006_v56 = vmax.f32 %v2345_v51, %v1974_v13  ;;  %v1976_v57 = vmul.f32 0.2, %v2347_v38 }
 0x279   :  { %v2007_v58 = vmax.f32 %v2346_v50, %v1975_v46  ;;  %v1977_v59 = vmul.f32 0.2, %v2348_v55 }
 0x27a   :  { %v2008_v60 = vmax.f32 %v2347_v38, %v1976_v57  ;;  %v2050_v52 = vmul.f32 %v2966_v28, %v2006_v56 }
 0x27b   :  { %v2009_v61 = vmax.f32 %v2348_v55, %v1977_v59  ;;  %2082 = vadd.xlane.f32.xlu0 %v2081_v49  ;;  %v1911_v62 = vpop.f32.mrb[8].mxu0  ;;  %v2051_v63 = vmul.f32 %v2970_v31, %v2007_v58 }
 0x27c   :  { %v2349_v0 = vadd.f32 %v1911_v62, %v2954_v18  ;;  %v1913_v1 = vpop.f32.mrb[9].mxu0  ;;  %v2052_v2 = vmul.f32 %v2966_v28, %v2008_v60 }
 0x27d   :  { %v2350_v3 = vadd.f32 %v1913_v1, %v2957_v47  ;;  %v1915_v4 = vpop.f32.mrb[10].mxu0  ;;  %v2084_v5 = vadd.f32 %v2051_v63, %v2050_v52  ;;  %v2053_v6 = vmul.f32 %v2970_v31, %v2009_v61 }
 0x27e   :  { %v1978_v7 = vmul.f32 0.2, %v2349_v0  ;;  %v2351_v8 = vadd.f32 %v1915_v4, %v2954_v18  ;;  %v1917_v9 = vpop.f32.mrb[11].mxu0 }
 0x27f   :  { %v1979_v10 = vmul.f32 0.2, %v2350_v3  ;;  %v2352_v11 = vadd.f32 %v1917_v9, %v2957_v47  ;;  %2085 = vadd.xlane.f32.xlu1 %v2084_v5  ;;  %v2087_v12 = vadd.f32 %v2053_v6, %v2052_v2 }
 0x280   :  { %v2010_v14 = vmax.f32 %v2349_v0, %v1978_v7  ;;  %v1980_v15 = vmul.f32 0.2, %v2351_v8 }
 0x281   :  { %v2011_v16 = vmax.f32 %v2350_v3, %v1979_v10  ;;  %v1981_v17 = vmul.f32 0.2, %v2352_v11 }
 0x282   :  { %v2012_v44 = vmax.f32 %v2351_v8, %v1980_v15  ;;  %v2054_v19 = vmul.f32 %v2966_v28, %v2010_v14 }
 0x283   :  { %v2013_v20 = vmax.f32 %v2352_v11, %v1981_v17  ;;  %2088 = vadd.xlane.f32.xlu1 %v2087_v12  ;;  %v1921_v21 = vpop.f32.mrb[12].mxu0  ;;  %v2055_v22 = vmul.f32 %v2970_v31, %v2011_v16 }
 0x284   :  { %v2353_v23 = vadd.f32 %v1921_v21, %v2954_v18  ;;  %v1923_v24 = vpop.f32.mrb[13].mxu0  ;;  %v2056_v25 = vmul.f32 %v2966_v28, %v2012_v44 }
 0x285   :  { %v2354_v26 = vadd.f32 %v1923_v24, %v2957_v47  ;;  %v1925_v27 = vpop.f32.mrb[14].mxu0  ;;  %v2090_v29 = vadd.f32 %v2055_v22, %v2054_v19  ;;  %v2057_v30 = vmul.f32 %v2970_v31, %v2013_v20 }
 0x286   :  { %v1982_v32 = vmul.f32 0.2, %v2353_v23  ;;  %v2355_v33 = vadd.f32 %v1925_v27, %v2954_v18  ;;  %v1927_v34 = vpop.f32.mrb[15].mxu0 }
 0x287   :  { %v1983_v35 = vmul.f32 0.2, %v2354_v26  ;;  %v2356_v36 = vadd.f32 %v1927_v34, %v2957_v47  ;;  %2091 = vadd.xlane.f32.xlu0 %v2090_v29  ;;  %v2093_v37 = vadd.f32 %v2057_v30, %v2056_v25 }
 0x288   :  { %v2014_v39 = vmax.f32 %v2353_v23, %v1982_v32  ;;  %v1984_v40 = vmul.f32 0.2, %v2355_v33 }
 0x289   :  { %v2015_v42 = vmax.f32 %v2354_v26, %v1983_v35  ;;  %v1985_v51 = vmul.f32 0.2, %v2356_v36  ;;  %2094 = vadd.xlane.f32.xlu1 %v2093_v37 }
 0x28a   :  { %v2016_v43 = vmax.f32 %v2355_v33, %v1984_v40  ;;  %v2058_v45 = vmul.f32 %v2966_v28, %v2014_v39 }
 0x28b   :  { %v2017_v50 = vmax.f32 %v2356_v36, %v1985_v51  ;;  %v1931_v53 = vpop.f32.mrb[16].mxu0  ;;  %v2059_v48 = vmul.f32 %v2970_v31, %v2015_v42 }
 0x28c   :  { %v2357_v54 = vadd.f32 %v1931_v53, %v2954_v18  ;;  %v1933_v13 = vpop.f32.mrb[17].mxu0  ;;  %v2060_v38 = vmul.f32 %v2966_v28, %v2016_v43 }
 0x28d   :  { %v2358_v41 = vadd.f32 %v1933_v13, %v2957_v47  ;;  %v1935_v46 = vpop.f32.mrb[18].mxu0  ;;  %v2096_v55 = vadd.f32 %v2059_v48, %v2058_v45  ;;  %v2061_v49 = vmul.f32 %v2970_v31, %v2017_v50 }
 0x28e   :  { %v1986_v56 = vmul.f32 0.2, %v2357_v54  ;;  %v2359_v57 = vadd.f32 %v1935_v46, %v2954_v18  ;;  %v1937_v58 = vpop.f32.mrb[19].mxu0 }
 0x28f   :  { %v1987_v59 = vmul.f32 0.2, %v2358_v41  ;;  %v2360_v60 = vadd.f32 %v1937_v58, %v2957_v47  ;;  %2097 = vadd.xlane.f32.xlu0 %v2096_v55  ;;  %v2099_v52 = vadd.f32 %v2061_v49, %v2060_v38 }
 0x290   :  { %v2018_v61 = vmax.f32 %v2357_v54, %v1986_v56  ;;  %v1988_v62 = vmul.f32 0.2, %v2359_v57 }
 0x291   :  { %v2019_v63 = vmax.f32 %v2358_v41, %v1987_v59  ;;  %v1989_v0 = vmul.f32 0.2, %v2360_v60  ;;  %2100 = vadd.xlane.f32.xlu1 %v2099_v52 }
 0x292   :  { %v2020_v1 = vmax.f32 %v2359_v57, %v1988_v62  ;;  %v2062_v2 = vmul.f32 %v2966_v28, %v2018_v61 }
 0x293   :  { %v2021_v3 = vmax.f32 %v2360_v60, %v1989_v0  ;;  %v1941_v4 = vpop.f32.mrb[20].mxu0  ;;  %v2063_v5 = vmul.f32 %v2970_v31, %v2019_v63 }
 0x294   :  { %v2361_v6 = vadd.f32 %v1941_v4, %v2954_v18  ;;  %v1943_v7 = vpop.f32.mrb[21].mxu0  ;;  %v2064_v8 = vmul.f32 %v2966_v28, %v2020_v1 }
 0x295   :  { %v2362_v9 = vadd.f32 %v1943_v7, %v2957_v47  ;;  %v1945_v10 = vpop.f32.mrb[22].mxu0  ;;  %v2102_v11 = vadd.f32 %v2063_v5, %v2062_v2  ;;  %v2065_v12 = vmul.f32 %v2970_v31, %v2021_v3 }
 0x296   :  { %v1990_v14 = vmul.f32 0.2, %v2361_v6  ;;  %v2363_v15 = vadd.f32 %v1945_v10, %v2954_v18  ;;  %v1947_v16 = vpop.f32.mrb[23].mxu0 }
 0x297   :  { %v1991_v17 = vmul.f32 0.2, %v2362_v9  ;;  %v2364_v44 = vadd.f32 %v1947_v16, %v2957_v47  ;;  %2103 = vadd.xlane.f32.xlu0 %v2102_v11  ;;  %v2105_v19 = vadd.f32 %v2065_v12, %v2064_v8 }
 0x298   :  { %v2022_v20 = vmax.f32 %v2361_v6, %v1990_v14  ;;  %v1992_v21 = vmul.f32 0.2, %v2363_v15  ;;  %v2127_v14 = vstv %s3053_s6  ;;  %s2732_s6 = smov [#allocation10]  }
 0x299   :  { %v2023_v22 = vmax.f32 %v2362_v9, %v1991_v17  ;;  %v1993_v23 = vmul.f32 0.2, %v2364_v44  ;;  %2106 = vadd.xlane.f32.xlu1 %v2105_v19  ;;  %s2187_s20 = sshll.u32 %s2732_s6, 4  ;;  %s2188_s20 = int_to_ptr.vmem [resolvable:$true] %s2187_s20 }
 0x29a   :  { %v2024_v24 = vmax.f32 %v2363_v15, %v1992_v21  ;;  %v2066_v25 = vmul.f32 %v2966_v28, %v2022_v20  ;;  %s2697_s21 = scalar_lea.vmem %s2188_s20, 16  ;;  %s2701_s22 = scalar_lea.vmem %s2188_s20, 32 }
 0x29b   :  { %v2025_v26 = vmax.f32 %v2364_v44, %v1993_v23  ;;  %v1951_v27 = vpop.f32.mrb[24].mxu0  ;;  %v2067_v29 = vmul.f32 %v2970_v31, %v2023_v22  ;;  %p2698_p10 = scmp.ne.s32.totalorder %s2188_s20, %s2697_s21  ;;  %p2702_p11 = scmp.lt.s32.totalorder %s2188_s20, %s2188_s20 }
 0x29c   :  { %v2365_v30 = vadd.f32 %v1951_v27, %v2954_v18  ;;  %v1953_v32 = vpop.f32.mrb[25].mxu0  ;;  %v2068_v33 = vmul.f32 %v2966_v28, %v2024_v24  ;;  %p2703_p12 = scmp.lt.s32.totalorder %s2701_s22, %s2697_s21 }
 0x29d   :  { %v2366_v34 = vadd.f32 %v1953_v32, %v2957_v47  ;;  %v1955_v35 = vpop.f32.mrb[26].mxu0  ;;  %v2108_v36 = vadd.f32 %v2067_v29, %v2066_v25  ;;  %v2069_v37 = vmul.f32 %v2970_v31, %v2025_v26 }
 0x29e   :  { %v1994_v39 = vmul.f32 0.2, %v2365_v30  ;;  %v2367_v40 = vadd.f32 %v1955_v35, %v2954_v18  ;;  %v1957_v42 = vpop.f32.mrb[27].mxu0  ;;  %p2704_p13 = por %p2703_p12, %p2702_p11 }
 0x29f   :  { %v1995_v51 = vmul.f32 0.2, %v2366_v34  ;;  %v2368_v43 = vadd.f32 %v1957_v42, %v2957_v47  ;;  %2109 = vadd.xlane.f32.xlu0 %v2108_v36  ;;  %v2111_v45 = vadd.f32 %v2069_v37, %v2068_v33 }
 0x2a0   :  { %v2026_v50 = vmax.f32 %v2365_v30, %v1994_v39  ;;  %v1996_v53 = vmul.f32 0.2, %v2367_v40  ;;  %p2705_p0 = pnand %p2704_p13, %p2698_p10 }
 0x2a1   :  { %v2027_v48 = vmax.f32 %v2366_v34, %v1995_v51  ;;  %v1997_v54 = vmul.f32 0.2, %v2368_v43  ;;  %2112 = vadd.xlane.f32.xlu1 %v2111_v45 }
 0x2a2   :  { %v2028_v13 = vmax.f32 %v2367_v40, %v1996_v53  ;;  %v2070_v38 = vmul.f32 %v2966_v28, %v2026_v50 }
 0x2a3   :  { %v2029_v41 = vmax.f32 %v2368_v43, %v1997_v54  ;;  %v1961_v46 = vpop.f32.mrb[28].mxu0  ;;  %v2071_v55 = vmul.f32 %v2970_v31, %v2027_v48 }
 0x2a4   :  { %v2369_v49 = vadd.f32 %v1961_v46, %v2954_v18  ;;  %v1963_v56 = vpop.f32.mrb[29].mxu0  ;;  %v2072_v57 = vmul.f32 %v2966_v28, %v2028_v13 }
 0x2a5   :  { %v2370_v58 = vadd.f32 %v1963_v56, %v2957_v47  ;;  %v1965_v59 = vpop.f32.mrb[30].mxu0  ;;  %v2114_v60 = vadd.f32 %v2071_v55, %v2070_v38  ;;  %v2073_v52 = vmul.f32 %v2970_v31, %v2029_v41 }
 0x2a6   :  { %v1998_v61 = vmul.f32 0.2, %v2369_v49  ;;  %v2371_v62 = vadd.f32 %v1965_v59, %v2954_v18  ;;  %v1967_v63 = vpop.f32.mrb[31].mxu0 }
 0x2a7   :  { %v1999_v0 = vmul.f32 0.2, %v2370_v58  ;;  %v2372_v1 = vadd.f32 %v1967_v63, %v2957_v47  ;;  %2115 = vadd.xlane.f32.xlu0 %v2114_v60  ;;  %v2117_v2 = vadd.f32 %v2073_v52, %v2072_v57 }
 0x2a8   :  { %v2030_v3 = vmax.f32 %v2369_v49, %v1998_v61  ;;  %v2000_v4 = vmul.f32 0.2, %v2371_v62 }
 0x2a9   :  { %v2031_v5 = vmax.f32 %v2370_v58, %v1999_v0  ;;  %v2001_v6 = vmul.f32 0.2, %v2372_v1  ;;  %2118 = vadd.xlane.f32.xlu1 %v2117_v2 }
 0x2aa   :  { %v2032_v7 = vmax.f32 %v2371_v62, %v2000_v4  ;;  %v2074_v8 = vmul.f32 %v2966_v28, %v2030_v3 }
 0x2ab   :  { %v2033_v9 = vmax.f32 %v2372_v1, %v2001_v6  ;;  %v2075_v10 = vmul.f32 %v2970_v31, %v2031_v5 }
 0x2ac   :  { %v2076_v11 = vmul.f32 %v2966_v28, %v2032_v7 }
 0x2ad   :  { %v2120_v18 = vadd.f32 %v2075_v10, %v2074_v8  ;;  %v2077_v12 = vmul.f32 %v2970_v31, %v2033_v9 }
 0x2af   :  { %2121 = vadd.xlane.f32.xlu0 %v2120_v18  ;;  %v2123_v47 = vadd.f32 %v2077_v12, %v2076_v11 }
 0x2b1   :  { %2124 = vadd.xlane.f32.xlu1 %v2123_v47 }
 0x304   :  { %v2080_v15 = vpop.xlane.xlu0 %2079 }
 0x305   :  { %v2128_v16 = vadd.f32 %v2127_v14, %v2080_v15 }
 0x307   :  { %2144 = vxpose.xlu0.b32.start [1/16] (narrow) %v2128_v16, 8 }
 0x308   :  { %v2083_v17 = vpop.xlane.xlu0 %2082 }
 0x309   :  { %v2129_v44 = vadd.f32 %v2127_v14, %v2083_v17 }
 0x30b   :  { %2145 = vxpose.xlu0.b32.cont [2/16] (narrow) %v2129_v44, 8 }
 0x30c   :  { %v2086_v19 = vpop.xlane.xlu1 %2085 }
 0x30d   :  { %v2130_v20 = vadd.f32 %v2127_v14, %v2086_v19 }
 0x30f   :  { %2146 = vxpose.xlu0.b32.cont [3/16] (narrow) %v2130_v20, 8 }
 0x310   :  { %v2089_v28 = vpop.xlane.xlu1 %2088 }
 0x311   :  { %v2131_v21 = vadd.f32 %v2127_v14, %v2089_v28 }
 0x313   :  { %2147 = vxpose.xlu0.b32.cont [4/16] (narrow) %v2131_v21, 8 }
 0x314   :  { %v2092_v31 = vpop.xlane.xlu0 %2091 }
 0x315   :  { %v2132_v22 = vadd.f32 %v2127_v14, %v2092_v31 }
 0x316   :  { %v2095_v23 = vpop.xlane.xlu1 %2094 }
 0x317   :  { %2148 = vxpose.xlu0.b32.cont [5/16] (narrow) %v2132_v22, 8  ;;  %v2133_v24 = vadd.f32 %v2127_v14, %v2095_v23 }
 0x31b   :  { %2149 = vxpose.xlu0.b32.cont [6/16] (narrow) %v2133_v24, 8 }
 0x31c   :  { %v2098_v25 = vpop.xlane.xlu0 %2097 }
 0x31d   :  { %v2134_v26 = vadd.f32 %v2127_v14, %v2098_v25 }
 0x31e   :  { %v2101_v27 = vpop.xlane.xlu1 %2100 }
 0x31f   :  { %2150 = vxpose.xlu0.b32.cont [7/16] (narrow) %v2134_v26, 8  ;;  %v2135_v29 = vadd.f32 %v2127_v14, %v2101_v27 }
 0x323   :  { %2151 = vxpose.xlu0.b32.cont [8/16] (narrow) %v2135_v29, 8 }
 0x324   :  { %v2104_v30 = vpop.xlane.xlu0 %2103 }
 0x325   :  { %v2136_v32 = vadd.f32 %v2127_v14, %v2104_v30 }
 0x326   :  { %v2107_v33 = vpop.xlane.xlu1 %2106 }
 0x327   :  { %2152 = vxpose.xlu0.b32.cont [9/16] (narrow) %v2136_v32, 8  ;;  %v2137_v34 = vadd.f32 %v2127_v14, %v2107_v33 }
 0x32b   :  { %2153 = vxpose.xlu0.b32.cont [10/16] (narrow) %v2137_v34, 8 }
 0x32c   :  { %v2110_v35 = vpop.xlane.xlu0 %2109 }
 0x32d   :  { %v2138_v36 = vadd.f32 %v2127_v14, %v2110_v35 }
 0x32e   :  { %v2113_v37 = vpop.xlane.xlu1 %2112 }
 0x32f   :  { %2154 = vxpose.xlu0.b32.cont [11/16] (narrow) %v2138_v36, 8  ;;  %v2139_v39 = vadd.f32 %v2127_v14, %v2113_v37 }
 0x333   :  { %2155 = vxpose.xlu0.b32.cont [12/16] (narrow) %v2139_v39, 8 }
 0x334   :  { %v2116_v40 = vpop.xlane.xlu0 %2115 }
 0x335   :  { %v2140_v42 = vadd.f32 %v2127_v14, %v2116_v40 }
 0x336   :  { %v2119_v51 = vpop.xlane.xlu1 %2118 }
 0x337   :  { %2156 = vxpose.xlu0.b32.cont [13/16] (narrow) %v2140_v42, 8  ;;  %v2141_v43 = vadd.f32 %v2127_v14, %v2119_v51 }
 0x33b   :  { %2157 = vxpose.xlu0.b32.cont [14/16] (narrow) %v2141_v43, 8 }
 0x33c   :  { %v2122_v45 = vpop.xlane.xlu0 %2121 }
 0x33d   :  { %v2142_v50 = vadd.f32 %v2127_v14, %v2122_v45 }
 0x33e   :  { %v2125_v53 = vpop.xlane.xlu1 %2124 }
 0x33f   :  { %2158 = vxpose.xlu0.b32.cont [15/16] (narrow) %v2142_v50, 8  ;;  %v2143_v48 = vadd.f32 %v2127_v14, %v2125_v53 }
 0x343   :  { %2159 = vxpose.xlu0.b32.end [16/16] (narrow) %v2143_v48, 8 }
 0x387   :  { %v2160_v54 = vpop.trf.xlu0 }
 0x388   :  { %v2176_v13 = vmul.f32 0.5, %v2160_v54 }
 0x38a   :  { %2629 = vtanh.f32 %v2176_v13 }
 0x394   :  { %v2630_v38 = vpop.eup %2629 }
 0x395   :  { %v2178_v41 = vadd.f32 1.0, %v2630_v38 }
 0x397   :  { %v2179_v46 = vmul.f32 0.5, %v2178_v41 }
 0x399   :  { %2180 = vst [vmem:[#allocation10] sm:$0x1] %v2179_v46 }
 0x39a   :  { %2708 = shalt.err (!%p2705_p0)
}
 0x39b   :  { %s2709_s1 = scalar_lea.hbm %s3054_s7, 16 }
 0x39c   :  { %p2710_p1 = scmp.ne.s32.totalorder %s3054_s7, %s2709_s1  ;;  %p2713_p2 = scmp.lt.u32.totalorder %s2709_s1, %s3054_s7 }
 0x39e   :  { %p2715_p3 = pnand %p2713_p2, %p2710_p1 }
 0x3a0   :  { %2718 = shalt.err (!%p2715_p3)
}
 0x3a1   :  { %2190 = dma.vmem_to_hbm [thread:$0]  %s2188_s20, 16, %s3054_s7, [#allocation6]  }
 0x3a2   :  { %2723 = dma.done.wait [#allocation6], 16  }
 0x3a3   :  { %2724 = vsyncadd [#allocation6], 4294967280 }
 0x3a4   :  { %2194 = vsyncpa [#allocation5], 1 }
 0x3a5   :  { %2195 = vsyncpa [#allocation8], 1 }
 0x3a6   :  { %2196 = vsyncpa [#allocation6], 1 }

</bundles_post_ra>
